<compile_context>
chip_gen: v6e
topology: v6e:2x2x1
jax: 0.10.0
libtpu: 0.0.40
codegen_flags: <defaults>
</compile_context>

<pallas_src>
import numpy as np

import jax
import jax.numpy as jnp
from jax.experimental import pallas as pl
from jax.experimental.pallas import tpu as pltpu

VMEM_LIMIT = 32 * 1024 * 1024  # safe on v5e/v6e/v7x; per-step tiles here are only a few MiB


# ----------------------------------------------------------------------------
# small helpers
# ----------------------------------------------------------------------------
def _round_up(x, m):
    return (x + m - 1) // m * m


def _pick_tile(total, target, align=128):
    """Largest tile <= target that divides `total` (multiple of `align` when tiling)."""
    if total <= target:
        return total
    t = (target // align) * align
    while t >= align:
        if total % t == 0:
            return t
        t -= align
    return total


def _to_rows(x_nchw, hw_pad, c_pad):
    """NCHW -> (N, HW_pad, C_pad) bf16, channels-last, zero-padded (single layout change)."""
    N, C, H, W = x_nchw.shape
    x = jnp.transpose(x_nchw, (0, 2, 3, 1)).reshape(N, H * W, C)
    x = jnp.pad(x, ((0, 0), (0, hw_pad - H * W), (0, c_pad - C)))
    return x.astype(jnp.bfloat16)


def _pad_weight(w_2d, rows, cols):
    w = jnp.pad(w_2d, ((0, rows - w_2d.shape[0]), (0, cols - w_2d.shape[1])))
    return w.astype(jnp.bfloat16)


def _interp_matrix(in_size, out_size):
    """align_corners=True bilinear interpolation matrix (out_size, in_size)."""
    m = np.zeros((out_size, in_size), np.float32)
    if out_size == 1:
        src = np.zeros((1,), np.float64)
    else:
        src = np.arange(out_size, dtype=np.float64) * (in_size - 1) / (out_size - 1)
    lo = np.minimum(np.floor(src).astype(np.int64), in_size - 1)
    hi = np.minimum(lo + 1, in_size - 1)
    frac = (src - lo).astype(np.float32)
    for i in range(out_size):
        m[i, lo[i]] += 1.0 - frac[i]
        m[i, hi[i]] += frac[i]
    return jnp.asarray(m)


def bilinear_resize_matmul(x, out_h, out_w):
    """F.interpolate(x, (out_h,out_w), 'bilinear', align_corners=True) on NCHW, via matmuls."""
    N, C, H, W = x.shape
    if (H, W) == (out_h, out_w):
        return x
    rh = _interp_matrix(H, out_h)   # (out_h, H)
    rw = _interp_matrix(W, out_w)   # (out_w, W)
    y = jnp.einsum('ia,ncab->ncib', rh, x, precision=jax.lax.Precision.HIGHEST)
    y = jnp.einsum('ncib,jb->ncij', y, rw, precision=jax.lax.Precision.HIGHEST)
    return y


# ----------------------------------------------------------------------------
# Pallas kernel 1: fused  f8_3 / f8_4 / concat / f9 / channel-L2-normalize
#   out fn[b, p, :] = f9(f)[:, p] / (||f9(f)[:, p]||_2 + 1e-5)   laid out as (HW, C)
# ----------------------------------------------------------------------------
def _fused_f9_kernel(xs_ref, fl_ref, fp_ref, w83_ref, w84_ref,
                     w9a_ref, w9b_ref, w9c_ref, fn_ref):
    f83 = jnp.maximum(
        jnp.dot(fl_ref[0], w83_ref[...], preferred_element_type=jnp.float32), 0.0)
    f84 = jnp.maximum(
        jnp.dot(fp_ref[0], w84_ref[...], preferred_element_type=jnp.float32), 0.0)
    y = jnp.dot(xs_ref[0], w9a_ref[...], preferred_element_type=jnp.float32)
    y = y + jnp.dot(f83.astype(jnp.bfloat16), w9b_ref[...],
                    preferred_element_type=jnp.float32)
    y = y + jnp.dot(f84.astype(jnp.bfloat16), w9c_ref[...],
                    preferred_element_type=jnp.float32)
    # channel L2 norm over lanes (padded output channels are zero -> no effect)
    nrm = jnp.sqrt(jnp.sum(y * y, axis=-1, keepdims=True))
    fn = y * pl.reciprocal(nrm + 1e-5, approx=True)
    fn_ref[0] = fn.astype(fn_ref.dtype)


def fused_f9_normalized(xs_p, fl_p, fp_p, w83p, w84p, w9ap, w9bp, w9cp, tile):
    N, hw_pad, xc = xs_p.shape
    c1p, c2p = fl_p.shape[2], fp_p.shape[2]
    cout = w9ap.shape[1]
    n_t = hw_pad // tile
    return pl.pallas_call(
        _fused_f9_kernel,
        out_shape=jax.ShapeDtypeStruct((N, hw_pad, cout), jnp.bfloat16),
        grid=(N, n_t),
        in_specs=[
            pl.BlockSpec((1, tile, xc), lambda b, t: (b, t, 0)),
            pl.BlockSpec((1, tile, c1p), lambda b, t: (b, t, 0)),
            pl.BlockSpec((1, tile, c2p), lambda b, t: (b, t, 0)),
            pl.BlockSpec((c1p, w83p.shape[1]), lambda b, t: (0, 0)),
            pl.BlockSpec((c2p, w84p.shape[1]), lambda b, t: (0, 0)),
            pl.BlockSpec((xc, cout), lambda b, t: (0, 0)),
            pl.BlockSpec((w9bp.shape[0], cout), lambda b, t: (0, 0)),
            pl.BlockSpec((w9cp.shape[0], cout), lambda b, t: (0, 0)),
        ],
        out_specs=pl.BlockSpec((1, tile, cout), lambda b, t: (b, t, 0)),
        compiler_params=pltpu.CompilerParams(
            dimension_semantics=("parallel", "parallel"),
            vmem_limit_bytes=VMEM_LIMIT),
    )(xs_p, fl_p, fp_p, w83p, w84p, w9ap, w9bp, w9cp)


# ----------------------------------------------------------------------------
# Pallas kernel 2: flash-style PCM propagation (never materializes (HW, HW) aff)
#   cam_rv[:, q] = (sum_p cam[:, p] * relu(fn_p . fn_q)) / (sum_p relu(fn_p . fn_q) + 1e-5)
# ----------------------------------------------------------------------------
def _pcm_kernel(cam_ref, fnr_ref, fnc_ref, o_ref, acc_ref, den_ref):
    i = pl.program_id(2)

    @pl.when(i == 0)
    def _():
        acc_ref[...] = jnp.zeros_like(acc_ref)
        den_ref[...] = jnp.zeros_like(den_ref)

    # a[p, q] = relu(fn_rows[p, :] . fn_cols[q, :])     (Ti, Tj), f32 accumulation
    a = jax.lax.dot_general(
        fnr_ref[0], fnc_ref[0],
        dimension_numbers=(((1,), (1,)), ((), ())),
        preferred_element_type=jnp.float32)
    a = jnp.maximum(a, 0.0)
    den_ref[...] += jnp.sum(a, axis=0, keepdims=True)                 # (1, Tj)
    acc_ref[...] += jnp.dot(cam_ref[0], a.astype(jnp.bfloat16),
                            preferred_element_type=jnp.float32)        # (K, Tj)

    @pl.when(i == pl.num_programs(2) - 1)
    def _():
        o_ref[0] = acc_ref[...] * pl.reciprocal(den_ref[...] + 1e-5, approx=True)


def pcm_propagate(cam_p, fn_p, tile):
    """cam_p: (N, K, HW_pad) bf16, fn_p: (N, HW_pad, C_pad) bf16 -> (N, K, HW_pad) f32."""
    N, K, hw_pad = cam_p.shape
    c = fn_p.shape[2]
    n_t = hw_pad // tile
    return pl.pallas_call(
        _pcm_kernel,
        out_shape=jax.ShapeDtypeStruct((N, K, hw_pad), jnp.float32),
        grid=(N, n_t, n_t),                       # (batch, out-col tiles, row tiles)
        in_specs=[
            pl.BlockSpec((1, K, tile), lambda b, j, i: (b, 0, i)),    # cam rows p
            pl.BlockSpec((1, tile, c), lambda b, j, i: (b, i, 0)),    # fn rows p
            pl.BlockSpec((1, tile, c), lambda b, j, i: (b, j, 0)),    # fn cols q
        ],
        out_specs=pl.BlockSpec((1, K, tile), lambda b, j, i: (b, 0, j)),
        scratch_shapes=[
            pltpu.VMEM((K, tile), jnp.float32),   # acc
            pltpu.VMEM((1, tile), jnp.float32),   # column-sum denom
        ],
        compiler_params=pltpu.CompilerParams(
            dimension_semantics=("parallel", "parallel", "arbitrary"),
            vmem_limit_bytes=VMEM_LIMIT),
    )(cam_p, fn_p, fn_p)


# ----------------------------------------------------------------------------
# Pallas kernel 3: max_onehot (all batches per grid step, tiled over HW)
# ----------------------------------------------------------------------------
def _max_onehot_kernel(x_ref, o_ref):
    for b in range(x_ref.shape[0]):        # small static batch loop, 2-D ops per slice
        x = x_ref[b]
        xmax = jnp.max(x, axis=0, keepdims=True)
        o_ref[b] = jnp.where(x == xmax, x, 0.0)


def max_onehot(x):
    """x: (N, K, H, W); zero every entry that is not the per-pixel channel max."""
    N, K, H, W = x.shape
    HW = H * W
    tile = _pick_tile(HW, 2048)
    n_t = HW // tile
    xf = x.reshape(N, K, HW)
    y = pl.pallas_call(
        _max_onehot_kernel,
        out_shape=jax.ShapeDtypeStruct((N, K, HW), x.dtype),
        grid=(n_t,),
        in_specs=[pl.BlockSpec((N, K, tile), lambda t: (0, 0, t))],
        out_specs=pl.BlockSpec((N, K, tile), lambda t: (0, 0, t)),
        compiler_params=pltpu.CompilerParams(dimension_semantics=("parallel",)),
    )(xf)
    return y.reshape(N, K, H, W)


# ----------------------------------------------------------------------------
# Plain-JAX glue
# ----------------------------------------------------------------------------
def adaptive_min_pooling_loss(x):
    # TODO(synk): torch.topk has no clean Pallas TPU primitive; lax.top_k in plain JAX.
    n, c, h, w = x.shape
    k = h * w // 4
    xm = jnp.max(x, axis=1).reshape(n, -1)
    y = -jax.lax.top_k(-xm, k)[0]                  # k smallest
    y = jnp.maximum(y, 0.0)
    return jnp.sum(y) / (k * n)


def init_seam_params(key, img_c=3, feature1_c=256, feature2_c=256):
    k1, k2, k3 = jax.random.split(key, 3)
    std83 = (2.0 / feature1_c) ** 0.5              # kaiming_normal_, fan_in, gain sqrt(2)
    std84 = (2.0 / feature2_c) ** 0.5
    w83 = std83 * jax.random.normal(k1, (64, feature1_c, 1, 1), jnp.float32)
    w84 = std84 * jax.random.normal(k2, (128, feature2_c, 1, 1), jnp.float32)
    fan_in, fan_out = 192 + img_c, 192             # xavier_uniform_, gain=4
    bound = 4.0 * (6.0 / (fan_in + fan_out)) ** 0.5
    w9 = jax.random.uniform(k3, (192, 192 + img_c, 1, 1), jnp.float32, -bound, bound)
    return w83, w84, w9


# ----------------------------------------------------------------------------
# SEAM forward_one (backbone / cam_head / calculate_bg_score outputs are inputs)
# ----------------------------------------------------------------------------
def seam_forward_one(img, feat_last, feat_prev, cam, cam_d_norm, w83, w84, w9):
    N, img_c, H, W = img.shape
    h, w = feat_last.shape[2], feat_last.shape[3]
    HW = h * w
    HW_pad = _round_up(HW, 128)
    tile = _pick_tile(HW_pad, 512)

    C1, C2 = feat_last.shape[1], feat_prev.shape[1]
    C1p, C2p = _round_up(C1, 128), _round_up(C2, 128)
    XCp = 128                                       # padded image-channel dim
    COUTp = 256                                     # 192 f9 output channels -> padded

    # --- channels-last, padded, bf16 activations (single layout conversion each) ---
    x_s = bilinear_resize_matmul(img, h, w)                         # (N, img_c, h, w)
    xs_p = _to_rows(x_s, HW_pad, XCp)                               # (N, HW_pad, 128)
    fl_p = _to_rows(feat_last, HW_pad, C1p)                         # (N, HW_pad, C1p)
    fp_p = _to_rows(feat_prev, HW_pad, C2p)                         # (N, HW_pad, C2p)

    # --- weights as (Cin, Cout), zero-padded; w9 split along the concat sources ---
    w83p = _pad_weight(w83.reshape(w83.shape[0], C1).T, C1p, 128)   # 64 -> 128 out cols
    w84p = _pad_weight(w84.reshape(w84.shape[0], C2).T, C2p, 128)
    w9t = w9.reshape(w9.shape[0], w9.shape[1]).T                    # (192+img_c, 192)
    w9ap = _pad_weight(w9t[:img_c], XCp, COUTp)                     # img part
    w9bp = _pad_weight(w9t[img_c:img_c + 64], 128, COUTp)           # f8_3 part
    w9cp = _pad_weight(w9t[img_c + 64:], 128, COUTp)                # f8_4 part

    # fused conv chain + channel normalization -> fn laid out (N, HW_pad, C_pad), bf16
    fn = fused_f9_normalized(xs_p, fl_p, fp_p, w83p, w84p, w9ap, w9bp, w9cp, tile)

    # PCM: resize cam_d_norm to feature resolution, propagate through affinity
    cam_i = bilinear_resize_matmul(cam_d_norm, h, w).reshape(N, -1, HW)
    cam_p = jnp.pad(cam_i, ((0, 0), (0, 0), (0, HW_pad - HW))).astype(jnp.bfloat16)
    cam_rv_flat = pcm_propagate(cam_p, fn, tile)[:, :, :HW]
    cam_rv = bilinear_resize_matmul(cam_rv_flat.reshape(N, -1, h, w), H, W)

    cam_out = bilinear_resize_matmul(cam, H, W)
    return cam_out, cam_rv


# ----------------------------------------------------------------------------
if __name__ == "__main__":
    key = jax.random.PRNGKey(0)
    kp, k_img, k_f1, k_f2, k_cam, k_camd, k_lab = jax.random.split(key, 7)

    N, IMG_C, H, W = 2, 3, 16, 16
    FEAT_C, h, w = 256, 8, 8
    K = 21  # number of CAM classes

    img = jax.random.normal(k_img, (N, IMG_C, H, W), jnp.float32)
    feat_last = jax.random.normal(k_f1, (N, FEAT_C, h, w), jnp.float32)   # features[-1]
    feat_prev = jax.random.normal(k_f2, (N, FEAT_C, h, w), jnp.float32)   # features[-2]
    cam = jnp.maximum(jax.random.normal(k_cam, (N, K, h, w), jnp.float32), 0.0)
    cam_d_norm = jax.nn.softmax(jax.random.normal(k_camd, (N, K, h, w), jnp.float32), axis=1)
    label = jax.random.bernoulli(k_lab, 0.5, (N, K, 1, 1)).astype(jnp.float32)

    w83, w84, w9 = init_seam_params(kp, IMG_C, FEAT_C, FEAT_C)

    fwd = jax.jit(seam_forward_one)
    cam_out, cam_rv = fwd(img, feat_last, feat_prev, cam, cam_d_norm, w83, w84, w9)

    # exercise the dependent helper functions
    loss_rvmin = adaptive_min_pooling_loss(cam_rv * label)
    cam_oh = max_onehot(cam_out)

    jax.block_until_ready((cam_out, cam_rv, loss_rvmin, cam_oh))

    assert cam_out.shape == (N, K, H, W)
    assert cam_rv.shape == (N, K, H, W)
    assert cam_oh.shape == (N, K, H, W)
    assert bool(jnp.all(jnp.isfinite(cam_out)))
    assert bool(jnp.all(jnp.isfinite(cam_rv)))
    assert bool(jnp.all(jnp.isfinite(cam_oh)))
    assert bool(jnp.isfinite(loss_rvmin))
    print("KERNEL_OK")
</pallas_src>

<mosaic_0001>
module attributes {stable_mosaic.version = 11 : i64} {
  func.func @_fused_f9_kernel(%arg0: i32, %arg1: i32, %arg2: memref<1x128x128xbf16, #tpu.memory_space<vmem>>, %arg3: memref<1x128x256xbf16, #tpu.memory_space<vmem>>, %arg4: memref<1x128x256xbf16, #tpu.memory_space<vmem>>, %arg5: memref<256x128xbf16, #tpu.memory_space<vmem>>, %arg6: memref<256x128xbf16, #tpu.memory_space<vmem>>, %arg7: memref<128x256xbf16, #tpu.memory_space<vmem>>, %arg8: memref<128x256xbf16, #tpu.memory_space<vmem>>, %arg9: memref<128x256xbf16, #tpu.memory_space<vmem>>, %arg10: memref<1x128x256xbf16, #tpu.memory_space<vmem>>) attributes {dimension_semantics = [#tpu.dimension_semantics<parallel>, #tpu.dimension_semantics<parallel>], iteration_bounds = array<i64: 2, 1>, scalar_prefetch = 0 : i64, scratch_operands = 0 : i64, tpu.core_type = #tpu.core_type<tc>, window_params = [{transform_indices = @transform_0, window_bounds = array<i64: 1, 128, 128>}, {transform_indices = @transform_1, window_bounds = array<i64: 1, 128, 256>}, {transform_indices = @transform_2, window_bounds = array<i64: 1, 128, 256>}, {pipeline_mode = #tpu.pipeline_mode<synchronous>, transform_indices = @transform_3, window_bounds = array<i64: 256, 128>}, {pipeline_mode = #tpu.pipeline_mode<synchronous>, transform_indices = @transform_4, window_bounds = array<i64: 256, 128>}, {pipeline_mode = #tpu.pipeline_mode<synchronous>, transform_indices = @transform_5, window_bounds = array<i64: 128, 256>}, {pipeline_mode = #tpu.pipeline_mode<synchronous>, transform_indices = @transform_6, window_bounds = array<i64: 128, 256>}, {pipeline_mode = #tpu.pipeline_mode<synchronous>, transform_indices = @transform_7, window_bounds = array<i64: 128, 256>}, {transform_indices = @transform_8, window_bounds = array<i64: 1, 128, 256>}]} {
    %c0 = arith.constant 0 : index
    %c0_0 = arith.constant 0 : index
    %c0_1 = arith.constant 0 : index
    %0 = vector.load %arg3[%c0, %c0_0, %c0_1] : memref<1x128x256xbf16, #tpu.memory_space<vmem>>, vector<1x128x256xbf16>
    %1 = vector.shape_cast %0 : vector<1x128x256xbf16> to vector<128x256xbf16>
    %c0_2 = arith.constant 0 : index
    %c0_3 = arith.constant 0 : index
    %2 = vector.load %arg5[%c0_2, %c0_3] : memref<256x128xbf16, #tpu.memory_space<vmem>>, vector<256x128xbf16>
    %cst = arith.constant dense<0.000000e+00> : vector<128x128xf32>
    %3 = tpu.matmul %1, %2, %cst {dimension_numbers = #tpu.dot_dimension_numbers<[1], [0], [0], [1], [0, 0, 1, 1], [], []>} : vector<128x256xbf16>, vector<256x128xbf16>, vector<128x128xf32> -> vector<128x128xf32>
    %cst_4 = arith.constant 0.000000e+00 : f32
    %4 = vector.broadcast %cst_4 : f32 to vector<128x128xf32>
    %5 = arith.maximumf %3, %4 : vector<128x128xf32>
    %c0_5 = arith.constant 0 : index
    %c0_6 = arith.constant 0 : index
    %c0_7 = arith.constant 0 : index
    %6 = vector.load %arg4[%c0_5, %c0_6, %c0_7] : memref<1x128x256xbf16, #tpu.memory_space<vmem>>, vector<1x128x256xbf16>
    %7 = vector.shape_cast %6 : vector<1x128x256xbf16> to vector<128x256xbf16>
    %c0_8 = arith.constant 0 : index
    %c0_9 = arith.constant 0 : index
    %8 = vector.load %arg6[%c0_8, %c0_9] : memref<256x128xbf16, #tpu.memory_space<vmem>>, vector<256x128xbf16>
    %cst_10 = arith.constant dense<0.000000e+00> : vector<128x128xf32>
    %9 = tpu.matmul %7, %8, %cst_10 {dimension_numbers = #tpu.dot_dimension_numbers<[1], [0], [0], [1], [0, 0, 1, 1], [], []>} : vector<128x256xbf16>, vector<256x128xbf16>, vector<128x128xf32> -> vector<128x128xf32>
    %cst_11 = arith.constant 0.000000e+00 : f32
    %10 = vector.broadcast %cst_11 : f32 to vector<128x128xf32>
    %11 = arith.maximumf %9, %10 : vector<128x128xf32>
    %c0_12 = arith.constant 0 : index
    %c0_13 = arith.constant 0 : index
    %c0_14 = arith.constant 0 : index
    %12 = vector.load %arg2[%c0_12, %c0_13, %c0_14] : memref<1x128x128xbf16, #tpu.memory_space<vmem>>, vector<1x128x128xbf16>
    %13 = vector.shape_cast %12 : vector<1x128x128xbf16> to vector<128x128xbf16>
    %c0_15 = arith.constant 0 : index
    %c0_16 = arith.constant 0 : index
    %14 = vector.load %arg7[%c0_15, %c0_16] : memref<128x256xbf16, #tpu.memory_space<vmem>>, vector<128x256xbf16>
    %cst_17 = arith.constant dense<0.000000e+00> : vector<128x256xf32>
    %15 = tpu.matmul %13, %14, %cst_17 {dimension_numbers = #tpu.dot_dimension_numbers<[1], [0], [0], [1], [0, 0, 1, 1], [], []>} : vector<128x128xbf16>, vector<128x256xbf16>, vector<128x256xf32> -> vector<128x256xf32>
    %16 = arith.truncf %5 : vector<128x128xf32> to vector<128x128xbf16>
    %c0_18 = arith.constant 0 : index
    %c0_19 = arith.constant 0 : index
    %17 = vector.load %arg8[%c0_18, %c0_19] : memref<128x256xbf16, #tpu.memory_space<vmem>>, vector<128x256xbf16>
    %cst_20 = arith.constant dense<0.000000e+00> : vector<128x256xf32>
    %18 = tpu.matmul %16, %17, %cst_20 {dimension_numbers = #tpu.dot_dimension_numbers<[1], [0], [0], [1], [0, 0, 1, 1], [], []>} : vector<128x128xbf16>, vector<128x256xbf16>, vector<128x256xf32> -> vector<128x256xf32>
    %19 = arith.addf %15, %18 : vector<128x256xf32>
    %20 = arith.truncf %11 : vector<128x128xf32> to vector<128x128xbf16>
    %c0_21 = arith.constant 0 : index
    %c0_22 = arith.constant 0 : index
    %21 = vector.load %arg9[%c0_21, %c0_22] : memref<128x256xbf16, #tpu.memory_space<vmem>>, vector<128x256xbf16>
    %cst_23 = arith.constant dense<0.000000e+00> : vector<128x256xf32>
    %22 = tpu.matmul %20, %21, %cst_23 {dimension_numbers = #tpu.dot_dimension_numbers<[1], [0], [0], [1], [0, 0, 1, 1], [], []>} : vector<128x128xbf16>, vector<128x256xbf16>, vector<128x256xf32> -> vector<128x256xf32>
    %23 = arith.addf %19, %22 : vector<128x256xf32>
    %24 = arith.mulf %23, %23 : vector<128x256xf32>
    %cst_24 = arith.constant dense<0.000000e+00> : vector<128xf32>
    %25 = vector.multi_reduction <add>, %24, %cst_24 [1] : vector<128x256xf32> to vector<128xf32>
    %26 = vector.shape_cast %25 : vector<128xf32> to vector<128x1xf32>
    %27 = math.sqrt %26 : vector<128x1xf32>
    %cst_25 = arith.constant 9.99999974E-6 : f32
    %28 = vector.broadcast %cst_25 : f32 to vector<128x1xf32>
    %29 = arith.addf %27, %28 : vector<128x1xf32>
    %30 = tpu.reciprocal %29 {approx = true} : vector<128x1xf32> -> vector<128x1xf32>
    %31 = vector.broadcast %30 : vector<128x1xf32> to vector<128x256xf32>
    %32 = arith.mulf %23, %31 : vector<128x256xf32>
    %33 = arith.truncf %32 : vector<128x256xf32> to vector<128x256xbf16>
    %c0_26 = arith.constant 0 : index
    %c0_27 = arith.constant 0 : index
    %c0_28 = arith.constant 0 : index
    %34 = vector.load %arg10[%c0_26, %c0_27, %c0_28] : memref<1x128x256xbf16, #tpu.memory_space<vmem>>, vector<1x128x256xbf16>
    %35 = vector.shape_cast %34 : vector<1x128x256xbf16> to vector<128x256xbf16>
    %36 = vector.shape_cast %33 : vector<128x256xbf16> to vector<1x128x256xbf16>
    tpu.vector_store %arg10[%c0_26, %c0_27, %c0_28], %36 {strides = array<i32>} : memref<1x128x256xbf16, #tpu.memory_space<vmem>>, vector<1x128x256xbf16>,
    return
  }
  func.func @transform_0(%arg0: i32, %arg1: i32) -> (i32, i32, i32) {
    %c0_i32 = arith.constant 0 : i32
    %c0_i32_0 = arith.constant 0 : i32
    return %arg0, %arg1, %c0_i32 : i32, i32, i32
  }
  func.func @transform_1(%arg0: i32, %arg1: i32) -> (i32, i32, i32) {
    %c0_i32 = arith.constant 0 : i32
    %c0_i32_0 = arith.constant 0 : i32
    return %arg0, %arg1, %c0_i32 : i32, i32, i32
  }
  func.func @transform_2(%arg0: i32, %arg1: i32) -> (i32, i32, i32) {
    %c0_i32 = arith.constant 0 : i32
    %c0_i32_0 = arith.constant 0 : i32
    return %arg0, %arg1, %c0_i32 : i32, i32, i32
  }
  func.func @transform_3(%arg0: i32, %arg1: i32) -> (i32, i32) {
    %c0_i32 = arith.constant 0 : i32
    %c0_i32_0 = arith.constant 0 : i32
    %c0_i32_1 = arith.constant 0 : i32
    return %c0_i32, %c0_i32_0 : i32, i32
  }
  func.func @transform_4(%arg0: i32, %arg1: i32) -> (i32, i32) {
    %c0_i32 = arith.constant 0 : i32
    %c0_i32_0 = arith.constant 0 : i32
    %c0_i32_1 = arith.constant 0 : i32
    return %c0_i32, %c0_i32_0 : i32, i32
  }
  func.func @transform_5(%arg0: i32, %arg1: i32) -> (i32, i32) {
    %c0_i32 = arith.constant 0 : i32
    %c0_i32_0 = arith.constant 0 : i32
    %c0_i32_1 = arith.constant 0 : i32
    return %c0_i32, %c0_i32_0 : i32, i32
  }
  func.func @transform_6(%arg0: i32, %arg1: i32) -> (i32, i32) {
    %c0_i32 = arith.constant 0 : i32
    %c0_i32_0 = arith.constant 0 : i32
    %c0_i32_1 = arith.constant 0 : i32
    return %c0_i32, %c0_i32_0 : i32, i32
  }
  func.func @transform_7(%arg0: i32, %arg1: i32) -> (i32, i32) {
    %c0_i32 = arith.constant 0 : i32
    %c0_i32_0 = arith.constant 0 : i32
    %c0_i32_1 = arith.constant 0 : i32
    return %c0_i32, %c0_i32_0 : i32, i32
  }
  func.func @transform_8(%arg0: i32, %arg1: i32) -> (i32, i32, i32) {
    %c0_i32 = arith.constant 0 : i32
    %c0_i32_0 = arith.constant 0 : i32
    return %arg0, %arg1, %c0_i32 : i32, i32, i32
  }
}

module attributes {stable_mosaic.version = 11 : i64} {
  func.func @_pcm_kernel(%arg0: i32, %arg1: i32, %arg2: i32, %arg3: memref<1x21x128xbf16, #tpu.memory_space<vmem>>, %arg4: memref<1x128x256xbf16, #tpu.memory_space<vmem>>, %arg5: memref<1x128x256xbf16, #tpu.memory_space<vmem>>, %arg6: memref<1x21x128xf32, #tpu.memory_space<vmem>>, %arg7: memref<21x128xf32, #tpu.memory_space<vmem>>, %arg8: memref<1x128xf32, #tpu.memory_space<vmem>>) attributes {dimension_semantics = [#tpu.dimension_semantics<parallel>, #tpu.dimension_semantics<parallel>, #tpu.dimension_semantics<arbitrary>], iteration_bounds = array<i64: 2, 1, 1>, scalar_prefetch = 0 : i64, scratch_operands = 2 : i64, tpu.core_type = #tpu.core_type<tc>, window_params = [{transform_indices = @transform_0, window_bounds = array<i64: 1, 21, 128>}, {transform_indices = @transform_1, window_bounds = array<i64: 1, 128, 256>}, {transform_indices = @transform_2, window_bounds = array<i64: 1, 128, 256>}, {transform_indices = @transform_3, window_bounds = array<i64: 1, 21, 128>}]} {
    %c0_i32 = arith.constant 0 : i32
    %0 = arith.cmpi eq, %arg2, %c0_i32 : i32
    %1 = arith.extui %0 : i1 to i32
    %c0_i32_0 = arith.constant 0 : i32
    %2 = arith.cmpi ne, %1, %c0_i32_0 : i32
    scf.if %2 {
      %cst_22 = arith.constant 0.000000e+00 : f32
      %25 = vector.broadcast %cst_22 : f32 to vector<21x128xf32>
      %c0_23 = arith.constant 0 : index
      %c0_24 = arith.constant 0 : index
      %26 = vector.load %arg7[%c0_23, %c0_24] : memref<21x128xf32, #tpu.memory_space<vmem>>, vector<21x128xf32>
      tpu.vector_store %arg7[%c0_23, %c0_24], %25 {strides = array<i32>} : memref<21x128xf32, #tpu.memory_space<vmem>>, vector<21x128xf32>,
      %cst_25 = arith.constant 0.000000e+00 : f32
      %27 = vector.broadcast %cst_25 : f32 to vector<1x128xf32>
      %c0_26 = arith.constant 0 : index
      %c0_27 = arith.constant 0 : index
      %28 = vector.load %arg8[%c0_26, %c0_27] : memref<1x128xf32, #tpu.memory_space<vmem>>, vector<1x128xf32>
      tpu.vector_store %arg8[%c0_26, %c0_27], %27 {strides = array<i32>} : memref<1x128xf32, #tpu.memory_space<vmem>>, vector<1x128xf32>,
    } else {
    }
    %c0 = arith.constant 0 : index
    %c0_1 = arith.constant 0 : index
    %c0_2 = arith.constant 0 : index
    %3 = vector.load %arg4[%c0, %c0_1, %c0_2] : memref<1x128x256xbf16, #tpu.memory_space<vmem>>, vector<1x128x256xbf16>
    %4 = vector.shape_cast %3 : vector<1x128x256xbf16> to vector<128x256xbf16>
    %c0_3 = arith.constant 0 : index
    %c0_4 = arith.constant 0 : index
    %c0_5 = arith.constant 0 : index
    %5 = vector.load %arg5[%c0_3, %c0_4, %c0_5] : memref<1x128x256xbf16, #tpu.memory_space<vmem>>, vector<1x128x256xbf16>
    %6 = vector.shape_cast %5 : vector<1x128x256xbf16> to vector<128x256xbf16>
    %cst = arith.constant dense<0.000000e+00> : vector<128x128xf32>
    %7 = tpu.matmul %4, %6, %cst {dimension_numbers = #tpu.dot_dimension_numbers<[1], [1], [0], [0], [0, 0, 1, 0], [], []>} : vector<128x256xbf16>, vector<128x256xbf16>, vector<128x128xf32> -> vector<128x128xf32>
    %cst_6 = arith.constant 0.000000e+00 : f32
    %8 = vector.broadcast %cst_6 : f32 to vector<128x128xf32>
    %9 = arith.maximumf %7, %8 : vector<128x128xf32>
    %c0_7 = arith.constant 0 : index
    %c0_8 = arith.constant 0 : index
    %10 = vector.load %arg8[%c0_7, %c0_8] : memref<1x128xf32, #tpu.memory_space<vmem>>, vector<1x128xf32>
    %cst_9 = arith.constant dense<0.000000e+00> : vector<128xf32>
    %11 = vector.multi_reduction <add>, %9, %cst_9 [0] : vector<128x128xf32> to vector<128xf32>
    %12 = vector.shape_cast %11 : vector<128xf32> to vector<1x128xf32>
    %13 = arith.addf %10, %12 : vector<1x128xf32>
    %c0_10 = arith.constant 0 : index
    %c0_11 = arith.constant 0 : index
    %14 = vector.load %arg8[%c0_10, %c0_11] : memref<1x128xf32, #tpu.memory_space<vmem>>, vector<1x128xf32>
    tpu.vector_store %arg8[%c0_10, %c0_11], %13 {strides = array<i32>} : memref<1x128xf32, #tpu.memory_space<vmem>>, vector<1x128xf32>,
    %c0_12 = arith.constant 0 : index
    %c0_13 = arith.constant 0 : index
    %15 = vector.load %arg7[%c0_12, %c0_13] : memref<21x128xf32, #tpu.memory_space<vmem>>, vector<21x128xf32>
    %c0_14 = arith.constant 0 : index
    %c0_15 = arith.constant 0 : index
    %c0_16 = arith.constant 0 : index
    %16 = vector.load %arg3[%c0_14, %c0_15, %c0_16] : memref<1x21x128xbf16, #tpu.memory_space<vmem>>, vector<1x21x128xbf16>
    %17 = vector.shape_cast %16 : vector<1x21x128xbf16> to vector<21x128xbf16>
    %18 = arith.truncf %9 : vector<128x128xf32> to vector<128x128xbf16>
    %cst_17 = arith.constant dense<0.000000e+00> : vector<21x128xf32>
    %19 = tpu.matmul %17, %18, %cst_17 {dimension_numbers = #tpu.dot_dimension_numbers<[1], [0], [0], [1], [0, 0, 1, 1], [], []>} : vector<21x128xbf16>, vector<128x128xbf16>, vector<21x128xf32> -> vector<21x128xf32>
    %20 = arith.addf %15, %19 : vector<21x128xf32>
    %c0_18 = arith.constant 0 : index
    %c0_19 = arith.constant 0 : index
    %21 = vector.load %arg7[%c0_18, %c0_19] : memref<21x128xf32, #tpu.memory_space<vmem>>, vector<21x128xf32>
    tpu.vector_store %arg7[%c0_18, %c0_19], %20 {strides = array<i32>} : memref<21x128xf32, #tpu.memory_space<vmem>>, vector<21x128xf32>,
    %c0_i32_20 = arith.constant 0 : i32
    %22 = arith.cmpi eq, %arg2, %c0_i32_20 : i32
    %23 = arith.extui %22 : i1 to i32
    %c0_i32_21 = arith.constant 0 : i32
    %24 = arith.cmpi ne, %23, %c0_i32_21 : i32
    scf.if %24 {
      %c0_22 = arith.constant 0 : index
      %c0_23 = arith.constant 0 : index
      %25 = vector.load %arg7[%c0_22, %c0_23] : memref<21x128xf32, #tpu.memory_space<vmem>>, vector<21x128xf32>
      %c0_24 = arith.constant 0 : index
      %c0_25 = arith.constant 0 : index
      %26 = vector.load %arg8[%c0_24, %c0_25] : memref<1x128xf32, #tpu.memory_space<vmem>>, vector<1x128xf32>
      %cst_26 = arith.constant 9.99999974E-6 : f32
      %27 = vector.broadcast %cst_26 : f32 to vector<1x128xf32>
      %28 = arith.addf %26, %27 : vector<1x128xf32>
      %29 = tpu.reciprocal %28 {approx = true} : vector<1x128xf32> -> vector<1x128xf32>
      %30 = vector.broadcast %29 : vector<1x128xf32> to vector<21x128xf32>
      %31 = arith.mulf %25, %30 : vector<21x128xf32>
      %c0_27 = arith.constant 0 : index
      %c0_28 = arith.constant 0 : index
      %c0_29 = arith.constant 0 : index
      %32 = vector.load %arg6[%c0_27, %c0_28, %c0_29] : memref<1x21x128xf32, #tpu.memory_space<vmem>>, vector<1x21x128xf32>
      %33 = vector.shape_cast %32 : vector<1x21x128xf32> to vector<21x128xf32>
      %34 = vector.shape_cast %31 : vector<21x128xf32> to vector<1x21x128xf32>
      tpu.vector_store %arg6[%c0_27, %c0_28, %c0_29], %34 {strides = array<i32>} : memref<1x21x128xf32, #tpu.memory_space<vmem>>, vector<1x21x128xf32>,
    } else {
    }
    return
  }
  func.func @transform_0(%arg0: i32, %arg1: i32, %arg2: i32) -> (i32, i32, i32) {
    %c0_i32 = arith.constant 0 : i32
    %c0_i32_0 = arith.constant 0 : i32
    return %arg0, %c0_i32, %arg2 : i32, i32, i32
  }
  func.func @transform_1(%arg0: i32, %arg1: i32, %arg2: i32) -> (i32, i32, i32) {
    %c0_i32 = arith.constant 0 : i32
    %c0_i32_0 = arith.constant 0 : i32
    return %arg0, %arg2, %c0_i32 : i32, i32, i32
  }
  func.func @transform_2(%arg0: i32, %arg1: i32, %arg2: i32) -> (i32, i32, i32) {
    %c0_i32 = arith.constant 0 : i32
    %c0_i32_0 = arith.constant 0 : i32
    return %arg0, %arg1, %c0_i32 : i32, i32, i32
  }
  func.func @transform_3(%arg0: i32, %arg1: i32, %arg2: i32) -> (i32, i32, i32) {
    %c0_i32 = arith.constant 0 : i32
    %c0_i32_0 = arith.constant 0 : i32
    return %arg0, %c0_i32, %arg1 : i32, i32, i32
  }
}

</mosaic_0001>

<bundles_post_ra>
// kernel: seam_forward_one.3
= control target key start
LH: loop header
LB: loop body
LE: loop exit
PB: predicated region body
PF: predicated region fallthrough
CT: control target
= control target key end

     0   :  { %s1055_s12 = smov 0   ;;  %s1057_s13 = smov 0   ;;  %s1179_s0 = inlined_call_operand.vmem [shape: bf16[2,21,128], index: 0, kind: input, shape index: {}]   ;;  %s1180_s1 = inlined_call_operand.vmem [shape: bf16[2,128,256], index: 1, kind: input, shape index: {}, may-alias: {1,2}]   ;;  %s1181_s2 = inlined_call_operand.vmem [shape: bf16[2,128,256], index: 2, kind: input, shape index: {}, may-alias: {1,2}]   ;;  %s1182_s3 = inlined_call_operand.vmem [shape: f32[2,21,128], index: 3, kind: output, shape index: {}]  }
   0x1   :  { %s1059_s14 = smov 0  }
   0x2 LB: > { %s32_s15 = sadd.s32 1, %s1028_s13  ;;  %p856_p0 = scmp.ge.s32.totalorder %s1032_s14, 1  ;;  %s1032_s14 = sphi %s1059_s14, %s13_s14   ;;  %s1028_s13 = sphi %s1057_s13, %s1184_s13   ;;  %s1024_s12 = sphi %s1055_s12, %s1183_s12  }
   0x3   : > { %p34_p1 = scmp.ge.s32.totalorder %s32_s15, 2  ;;  %p199_p2 = scmp.lt.s32.totalorder %s1032_s14, 3 }
   0x5   : > { %s1186_s15 = smov (%p34_p1, %s32_s15), 0  ;;  %p200_p3 = pnand %p856_p0, %p199_p2 }
   0x6   : > { %p249_p4 = scmp.lt.s32.totalorder (!%p200_p3), %s1024_s12, 1 }
   0x7   : > { %203 = sbr.rel (%p200_p3) target bundleno = 575 (0x23f), region = 32 }
   0xc   : > { %s1188_s12 = smov (!%p249_p4, %s1024_s12), 1  ;;  %v1034_v32 = vmov 0.0  }
   0xd   : > { %s899_s16 = sshll.u32 %s1188_s12, 7  ;;  %294 = vst [vmem:[#allocation2 + $0x8] sm:$0x1f] %v1034_v32  ;;  %295 = vst [vmem:[#allocation3] sm:$0x1] %v1034_v32  ;;  %s931_s23 = smul.u32 12, %s1188_s12 }
   0xe   : > { %s1079_s19 = scalar_lea.vmem %s1181_s2, %s899_s16  ;;  %s1089_s22 = scalar_lea.vmem %s1180_s1, %s899_s16 }
   0xf   : > { %v958_v0 = vld [vmem:[%s1079_s19 + $0x74] ss:$8 sps:$4 sm:$0xff]   ;;  %v960_v1 = vld [vmem:[%s1079_s19 + $0x70] ss:$8 sps:$4 sm:$0xff]   ;;  %v961_v2 = vld [vmem:[%s1079_s19 + $0x64] ss:$8 sps:$4 sm:$0xff]   ;;  %s1122_s26 = scalar_lea.vmem %s1179_s0, %s931_s23 }
  0x10   : > { %488 = vmatprep.subr.bf16.mxu0 %v958_v0  ;;  %v963_v3 = vld [vmem:[%s1079_s19 + $0x60] ss:$8 sps:$4 sm:$0xff]   ;;  %v964_v4 = vld [vmem:[%s1079_s19 + $0x54] ss:$8 sps:$4 sm:$0xff]   ;;  %v984_v5 = vld [vmem:[%s1089_s22 + $0x4] ss:$8 sps:$4 sm:$0xff]  }
  0x11   : > { %489 = vmatpush1.bf16.xpose.msra.mxu0 %v960_v1  ;;  %520 = vmatprep.mubr.bf16.mxu0 %v984_v5  ;;  %v966_v6 = vld [vmem:[%s1079_s19 + $0x50] ss:$8 sps:$4 sm:$0xff]   ;;  %v967_v7 = vld [vmem:[%s1079_s19 + $0x44] ss:$8 sps:$4 sm:$0xff]   ;;  %v969_v8 = vld [vmem:[%s1079_s19 + $0x40] ss:$8 sps:$4 sm:$0xff]  }
  0x12   : > { %490 = vmatprep.subr.bf16.mxu0 %v961_v2  ;;  %v970_v9 = vld [vmem:[%s1079_s19 + $0x34] ss:$8 sps:$4 sm:$0xff]   ;;  %v972_v10 = vld [vmem:[%s1079_s19 + $0x30] ss:$8 sps:$4 sm:$0xff]   ;;  %v973_v11 = vld [vmem:[%s1079_s19 + $0x24] ss:$8 sps:$4 sm:$0xff]  }
  0x13   : > { %v975_v12 = vld [vmem:[%s1079_s19 + $0x20] ss:$8 sps:$4 sm:$0xff]   ;;  %v976_v13 = vld [vmem:[%s1079_s19 + $0x14] ss:$8 sps:$4 sm:$0xff]   ;;  %v978_v14 = vld [vmem:[%s1079_s19 + $0x10] ss:$8 sps:$4 sm:$0xff]  }
  0x14   : > { %v979_v15 = vld [vmem:[%s1079_s19 + $0x4] ss:$8 sps:$4 sm:$0xff]   ;;  %v981_v16 = vld [vmem:[%s1079_s19] ss:$8 sps:$4 sm:$0xff]   ;;  %v985_v18 = vld [vmem:[%s1089_s22 + $0x14] ss:$8 sps:$4 sm:$0xff]  }
  0x15   : > { %v982_v17 = vld [vmem:[%s1089_s22] ss:$8 sps:$4 sm:$0xff]   ;;  %v987_v19 = vld [vmem:[%s1089_s22 + $0x10] ss:$8 sps:$4 sm:$0xff]   ;;  %v988_v20 = vld [vmem:[%s1089_s22 + $0x24] ss:$8 sps:$4 sm:$0xff]  }
  0x16   : > { %v990_v21 = vld [vmem:[%s1089_s22 + $0x20] ss:$8 sps:$4 sm:$0xff]   ;;  %v991_v22 = vld [vmem:[%s1089_s22 + $0x34] ss:$8 sps:$4 sm:$0xff]   ;;  %v993_v23 = vld [vmem:[%s1089_s22 + $0x30] ss:$8 sps:$4 sm:$0xff]  }
  0x17   : > { %v994_v24 = vld [vmem:[%s1089_s22 + $0x44] ss:$8 sps:$4 sm:$0xff]   ;;  %v996_v25 = vld [vmem:[%s1089_s22 + $0x40] ss:$8 sps:$4 sm:$0xff]   ;;  %v997_v26 = vld [vmem:[%s1089_s22 + $0x54] ss:$8 sps:$4 sm:$0xff]  }
  0x18   : > { %v999_v27 = vld [vmem:[%s1089_s22 + $0x50] ss:$8 sps:$4 sm:$0xff]   ;;  %v1000_v28 = vld [vmem:[%s1089_s22 + $0x64] ss:$8 sps:$4 sm:$0xff]   ;;  %v1002_v29 = vld [vmem:[%s1089_s22 + $0x60] ss:$8 sps:$4 sm:$0xff]  }
  0x19   : > { %491 = vmatpush1.bf16.xpose.msra.mxu0 %v963_v3  ;;  %v1003_v30 = vld [vmem:[%s1089_s22 + $0x74] ss:$8 sps:$4 sm:$0xff]   ;;  %v1005_v31 = vld [vmem:[%s1089_s22 + $0x70] ss:$8 sps:$4 sm:$0xff]   ;;  %v1006_v33 = vld [vmem:[%s1122_s26] sm:$0xff]   ;;  %s932_s27 = smul.u32 24, %s1188_s12 }
  0x1a   : > { %492 = vmatprep.subr.bf16.mxu0 %v964_v4  ;;  %927 = vmatprep.mubr.bf16.mxu1 %v1006_v33 }
  0x1b   : > { %s286_s30 = scalar_lea.vmem %s1182_s3, %s932_s27 }
  0x21   : > { %493 = vmatpush1.bf16.xpose.msra.mxu0 %v966_v6 }
  0x22   : > { %494 = vmatprep.subr.bf16.mxu0 %v967_v7 }
  0x29   : > { %495 = vmatpush1.bf16.xpose.msra.mxu0 %v969_v8 }
  0x2a   : > { %496 = vmatprep.subr.bf16.mxu0 %v970_v9 }
  0x31   : > { %497 = vmatpush1.bf16.xpose.msra.mxu0 %v972_v10 }
  0x32   : > { %498 = vmatprep.subr.bf16.mxu0 %v973_v11 }
  0x39   : > { %499 = vmatpush1.bf16.xpose.msra.mxu0 %v975_v12 }
  0x3a   : > { %500 = vmatprep.subr.bf16.mxu0 %v976_v13 }
  0x41   : > { %501 = vmatpush1.bf16.xpose.msra.mxu0 %v978_v14 }
  0x42   : > { %502 = vmatprep.subr.bf16.mxu0 %v979_v15 }
  0x49   : > { %503 = vmatpush1.bf16.xpose.msra.mxu0 %v981_v16 }
  0x50   : > { %521 = vmatmul.mubr.bf16.vlgmr.msra.gmra.mxu0 %v982_v17 }
  0x51   : > { %528 = vmatprep.mubr.bf16.mxu0 %v985_v18 }
  0x58   : > { %529 = vmatmul.mubr.bf16.gmra.mxu0 %v987_v19 }
  0x59   : > { %536 = vmatprep.mubr.bf16.mxu0 %v988_v20 }
  0x60   : > { %537 = vmatmul.mubr.bf16.gmra.mxu0 %v990_v21 }
  0x61   : > { %544 = vmatprep.mubr.bf16.mxu0 %v991_v22 }
  0x68   : > { %545 = vmatmul.mubr.bf16.gmra.mxu0 %v993_v23 }
  0x69   : > { %552 = vmatprep.mubr.bf16.mxu0 %v994_v24 }
  0x70   : > { %553 = vmatmul.mubr.bf16.gmra.mxu0 %v996_v25 }
  0x71   : > { %560 = vmatprep.mubr.bf16.mxu0 %v997_v26 }
  0x78   : > { %561 = vmatmul.mubr.bf16.gmra.mxu0 %v999_v27 }
  0x79   : > { %568 = vmatprep.mubr.bf16.mxu0 %v1000_v28 }
  0x80   : > { %569 = vmatmul.mubr.bf16.gmra.mxu0 %v1002_v29 }
  0x81   : > { %576 = vmatprep.mubr.bf16.mxu0 %v1003_v30 }
  0x88   : > { %577 = vmatmul.mubr.bf16.gmra.mxu0 %v1005_v31 }
 0x110   : > { %v1125_v34 = vpop.f32.mrf.mxu0 }
 0x111   : > { %v585_v52 = vmax.f32 %v1125_v34, 0.0 }
 0x112   : > { %v524_v35 = vpop.f32.mrf.mxu0 }
 0x114   : > { %v1127_v36 = vpop.f32.mrf.mxu0 }
 0x115   : > { %v586_v50 = vmax.f32 %v1127_v36, 0.0 }
 0x116   : > { %v527_v37 = vpop.f32.mrf.mxu0 }
 0x117   : > { %v602_v55 = vadd.f32 %v586_v50, %v585_v52 }
 0x118   : > { %v1129_v38 = vpop.f32.mrf.mxu0 }
 0x119   : > { %v587_v53 = vmax.f32 %v1129_v38, 0.0  ;;  %v713_v38 = vlaneseq }
 0x11a   : > { %v532_v39 = vpop.f32.mrf.mxu0 }
 0x11b   : > { %v603_v58 = vadd.f32 %v602_v55, %v587_v53  ;;  %v631_v55 = vpack.c.bf16 %v586_v50, %v585_v52 }
 0x11c   : > { %v1131_v40 = vpop.f32.mrf.mxu0 }
 0x11d   : > { %v588_v56 = vmax.f32 %v1131_v40, 0.0  ;;  %v627_v40 = vld [vmem:[#allocation2 + $0x8] sm:$0x1f] }
 0x11e   : > { %v535_v41 = vpop.f32.mrf.mxu0 }
 0x11f   : > { %v604_v61 = vadd.f32 %v603_v58, %v588_v56 }
 0x120   : > { %v1133_v42 = vpop.f32.mrf.mxu0 }
 0x121   : > { %v589_v59 = vmax.f32 %v1133_v42, 0.0 }
 0x122   : > { %v540_v43 = vpop.f32.mrf.mxu0 }
 0x123   : > { %v605_v0 = vadd.f32 %v604_v61, %v589_v59 }
 0x124   : > { %v1135_v44 = vpop.f32.mrf.mxu0 }
 0x125   : > { %v590_v62 = vmax.f32 %v1135_v44, 0.0 }
 0x126   : > { %v543_v45 = vpop.f32.mrf.mxu0 }
 0x127   : > { %v606_v3 = vadd.f32 %v605_v0, %v590_v62 }
 0x128   : > { %v1137_v46 = vpop.f32.mrf.mxu0 }
 0x129   : > { %v591_v1 = vmax.f32 %v1137_v46, 0.0  ;;  %v601_v46 = vld [vmem:[#allocation3] sm:$0x1] }
 0x12a   : > { %v548_v47 = vpop.f32.mrf.mxu0 }
 0x12b   : > { %v607_v6 = vadd.f32 %v606_v3, %v591_v1 }
 0x12c   : > { %v1139_v48 = vpop.f32.mrf.mxu0 }
 0x12d   : > { %v592_v4 = vmax.f32 %v1139_v48, 0.0 }
 0x12e   : > { %v551_v49 = vpop.f32.mrf.mxu0 }
 0x12f   : > { %v608_v9 = vadd.f32 %v607_v6, %v592_v4  ;;  %v634_v48 = vpack.c.bf16 %v592_v4, %v591_v1 }
 0x130   : > { %v554_v51 = vpop.f32.mrf.mxu0 }
 0x131   : > { %v593_v7 = vmax.f32 %v554_v51, 0.0  ;;  %v633_v51 = vpack.c.bf16 %v590_v62, %v589_v59 }
 0x132   : > { %v556_v54 = vpop.f32.mrf.mxu0 }
 0x133   : > { %v609_v12 = vadd.f32 %v608_v9, %v593_v7  ;;  %v632_v54 = vpack.c.bf16 %v588_v56, %v587_v53 }
 0x134   : > { %v557_v57 = vpop.f32.mrf.mxu0 }
 0x135   : > { %v594_v10 = vmax.f32 %v557_v57, 0.0  ;;  %v1007_v57 = vld [vmem:[%s1122_s26 + $0x8] ss:$0 sps:$4 sm:$0x77]  }
 0x136   : > { %v559_v60 = vpop.f32.mrf.mxu0 }
 0x137   : > { %v610_v15 = vadd.f32 %v609_v12, %v594_v10  ;;  %v635_v44 = vpack.c.bf16 %v594_v10, %v593_v7  ;;  %v714_v60 = vshrl.u32 %v713_v38, 7 }
 0x138   : > { %v562_v63 = vpop.f32.mrf.mxu0 }
 0x139   : > { %v595_v13 = vmax.f32 %v562_v63, 0.0  ;;  %v715_v53 = vsub.s32 0, %v714_v60 }
 0x13a   : > { %v564_v2 = vpop.f32.mrf.mxu0 }
 0x13b   : > { %v611_v18 = vadd.f32 %v610_v15, %v595_v13 }
 0x13c   : > { %v565_v5 = vpop.f32.mrf.mxu0 }
 0x13d   : > { %v596_v16 = vmax.f32 %v565_v5, 0.0 }
 0x13e   : > { %v567_v8 = vpop.f32.mrf.mxu0 }
 0x13f   : > { %v612_v21 = vadd.f32 %v611_v18, %v596_v16  ;;  %v636_v41 = vpack.c.bf16 %v596_v16, %v595_v13 }
 0x140   : > { %v570_v11 = vpop.f32.mrf.mxu0 }
 0x141   : > { %v597_v19 = vmax.f32 %v570_v11, 0.0 }
 0x142   : > { %v572_v14 = vpop.f32.mrf.mxu0 }
 0x143   : > { %v613_v24 = vadd.f32 %v612_v21, %v597_v19 }
 0x144   : > { %v573_v17 = vpop.f32.mrf.mxu0 }
 0x145   : > { %v598_v22 = vmax.f32 %v573_v17, 0.0 }
 0x146   : > { %v575_v20 = vpop.f32.mrf.mxu0 }
 0x147   : > { %v614_v27 = vadd.f32 %v613_v24, %v598_v22  ;;  %v637_v35 = vpack.c.bf16 %v598_v22, %v597_v19 }
 0x148   : > { %v578_v23 = vpop.f32.mrf.mxu0 }
 0x149   : > { %v599_v25 = vmax.f32 %v578_v23, 0.0 }
 0x14a   : > { %v580_v26 = vpop.f32.mrf.mxu0 }
 0x14b   : > { %v615_v29 = vadd.f32 %v614_v27, %v599_v25 }
 0x14c   : > { %v581_v28 = vpop.f32.mrf.mxu0 }
 0x14d   : > { %v600_v30 = vmax.f32 %v581_v28, 0.0 }
 0x14e   : > { %v583_v31 = vpop.f32.mrf.mxu0 }
 0x14f   : > { %v616_v32 = vadd.f32 %v615_v29, %v600_v30  ;;  %v638_v33 = vpack.c.bf16 %v600_v30, %v599_v25 }
 0x151   : > { %v617_v37 = vrot.slane %v616_v32, 4  ;;  %911 = vmatprep.subr.bf16.mxu1 %v638_v33 }
 0x152   : > { %912 = vmatpush3.bf16.msra.mxu1 %v638_v33 }
 0x153   : > { %v618_v39 = vadd.f32 %v617_v37, %v616_v32  ;;  %913 = vmatprep.subr.bf16.mxu1 %v637_v35 }
 0x155   : > { %v619_v42 = vrot.slane %v618_v39, 2 }
 0x156   : > { %914 = vmatpush3.bf16.msra.mxu1 %v637_v35 }
 0x157   : > { %v620_v43 = vadd.f32 %v619_v42, %v618_v39  ;;  %915 = vmatprep.subr.bf16.mxu1 %v636_v41 }
 0x159   : > { %v621_v45 = vrot.slane %v620_v43, 1 }
 0x15a   : > { %916 = vmatpush3.bf16.msra.mxu1 %v636_v41 }
 0x15b   : > { %v622_v47 = vadd.f32 %v621_v45, %v620_v43  ;;  %917 = vmatprep.subr.bf16.mxu1 %v635_v44 }
 0x15d   : > { %v623_v49 = vadd.f32 %v622_v47, %v601_v46 }
 0x15e   : > { %918 = vmatpush3.bf16.msra.mxu1 %v635_v44 }
 0x15f   : > { %919 = vmatprep.subr.bf16.mxu1 %v634_v48  ;;  %624 = vst [vmem:[#allocation3] sm:$0x1] %v623_v49 }
 0x162   : > { %920 = vmatpush3.bf16.msra.mxu1 %v634_v48 }
 0x163   : > { %921 = vmatprep.subr.bf16.mxu1 %v633_v51 }
 0x166   : > { %922 = vmatpush3.bf16.msra.mxu1 %v633_v51  ;;  %v709_v58 = vld [vmem:[#allocation3] sm:$0x1] }
 0x167   : > { %923 = vmatprep.subr.bf16.mxu1 %v632_v54  ;;  %v710_v59 = vadd.f32 1e-05, %v709_v58 }
 0x169   : > { %1008 = vrcp.f32 %v710_v59 }
 0x16a   : > { %924 = vmatpush3.bf16.msra.mxu1 %v632_v54 }
 0x16b   : > { %925 = vmatprep.subr.bf16.mxu1 %v631_v55 }
 0x16e   : > { %926 = vmatpush3.bf16.msra.mxu1 %v631_v55 }
 0x171   : > { %928 = vmatmul.mubr.bf16.vlgmr.msra.gmra.mxu1 %v1007_v57 }
 0x176   : > { %v1009_v56 = vpop.eup %1008 }
 0x177   : > { %v716_v36 = vrot.slane %v1009_v56, %v715_v53 }
 0x231   : > { %v929_v61 = vpop.f32.mrf.mxu1 }
 0x232   : > { %v699_v62 = vadd.f32 %v929_v61, %v627_v40 }
 0x233   : > { %v683_v34 = vpop.f32.mrf.mxu1 }
 0x234   : > { %702 = vst [vmem:[#allocation2 + $0x8] sm:$0x1f] %v699_v62  ;;  %v718_v52 = vmul.f32 %v716_v36, %v683_v34 }
 0x235   : > { %v930_v50 = vpop.f32.mrf.mxu1 }
 0x236   : > { %721 = vst [vmem:[%s286_s30] sm:$0xff] %v718_v52 }
 0x237   : > { %v686_v63 = vpop.f32.mrf.mxu1 }
 0x238   : > { %v719_v0 = vmul.f32 %v716_v36, %v686_v63 }
 0x23a   : > { %722 = vst [vmem:[%s286_s30 + $0x8] sm:$0xff] %v719_v0 }
 0x23b   : > { %v708_v1 = vld [vmem:[#allocation2 + $0x8] sm:$0x1f] }
 0x23c   : > { %v720_v2 = vmul.f32 %v716_v36, %v708_v1 }
 0x23e   : > { %723 = vst [vmem:[%s286_s30 + $0x10] sm:$0x1f] %v720_v2 }
 0x23f PF: > { %s13_s14 = sadd.s32 1, %s1032_s14   ;;  %s1183_s12 = smov %s1028_s13 }
 0x240   : > { %p10_p5 = scmp.ge.s32.totalorder %s13_s14, 4   ;;  %s1184_s13 = smov %s1186_s15 }
 0x242   :  { %12 = sbr.rel (!%p10_p5) target bundleno = 2 (0x2), region = 76 }

// kernel: seam_forward_one.2
= control target key start
LH: loop header
LB: loop body
LE: loop exit
PB: predicated region body
PF: predicated region fallthrough
CT: control target
= control target key end

     0   :  { %s2976_s27 = smov 0   ;;  %s2978_s28 = smov 0   ;;  %s3745_s0 = inlined_call_operand.vmem [shape: bf16[2,128,128], index: 0, kind: input, shape index: {}]   ;;  %s3746_s1 = inlined_call_operand.vmem [shape: bf16[2,128,256], index: 1, kind: input, shape index: {}]   ;;  %s3747_s2 = inlined_call_operand.vmem [shape: bf16[2,128,256], index: 2, kind: input, shape index: {}]   ;;  %s3748_s3 = inlined_call_operand.vmem [shape: bf16[256,128], index: 3, kind: input, shape index: {}]   ;;  %s3749_s4 = inlined_call_operand.vmem [shape: bf16[256,128], index: 4, kind: input, shape index: {}]   ;;  %s3750_s5 = inlined_call_operand.vmem [shape: bf16[128,256], index: 5, kind: input, shape index: {}]   ;;  %s3751_s6 = inlined_call_operand.vmem [shape: bf16[128,256], index: 6, kind: input, shape index: {}]   ;;  %s3752_s7 = inlined_call_operand.vmem [shape: bf16[128,256], index: 7, kind: input, shape index: {}]   ;;  %s3753_s8 = inlined_call_operand.vmem [shape: bf16[2,128,256], index: 8, kind: output, shape index: {}]  }
   0x1   :  { %s2980_s29 = smov 0  }
   0x2 LB: > { %s30_s30 = sadd.s32 1, %s2924_s28  ;;  %p2346_p0 = scmp.ge.s32.totalorder %s2928_s29, 1  ;;  %s2928_s29 = sphi %s2980_s29, %s18_s29   ;;  %s2924_s28 = sphi %s2978_s28, %s3755_s28   ;;  %s2920_s27 = sphi %s2976_s27, %s3754_s27  }
   0x3   : > { %p32_p1 = scmp.ge.s32.totalorder %s30_s30, 2  ;;  %p319_p2 = scmp.lt.s32.totalorder %s2928_s29, 3 }
   0x5   : > { %s3757_s30 = smov (%p32_p1, %s30_s30), 0  ;;  %p320_p3 = pnand %p2346_p0, %p319_p2 }
   0x6   : > { %p383_p4 = scmp.lt.s32.totalorder (!%p320_p3), %s2920_s27, 1 }
   0x7   : > { %323 = sbr.rel (%p320_p3) target bundleno = 753 (0x2f1), region = 52 }
   0xc   : > { %v2682_v0 = vld [vmem:[%s3748_s3 + $0x78] sm:$0xff]   ;;  %v2684_v2 = vld [vmem:[%s3748_s3 + $0x70] sm:$0xff]   ;;  %v2686_v4 = vld [vmem:[%s3748_s3 + $0x68] sm:$0xff]   ;;  %s3759_s27 = smov (!%p383_p4, %s2920_s27), 1 }
   0xd   : > { %v2683_v1 = vld [vmem:[%s3748_s3 + $0x38] sm:$0xff]   ;;  %2513 = vmatprep.subr.bf16.mxu0 %v2682_v0  ;;  %2641 = vmatprep.subr.bf16.mxu1 %v2682_v0  ;;  %v2685_v3 = vld [vmem:[%s3748_s3 + $0x30] sm:$0xff]   ;;  %v2687_v5 = vld [vmem:[%s3748_s3 + $0x28] sm:$0xff]   ;;  %s3021_s25 = sshll.u32 %s3759_s27, 7  ;;  %s2493_s24 = sshll.u32 %s3759_s27, 6 }
   0xe   : > { %2514 = vmatpush3.bf16.msra.mxu0 %v2683_v1  ;;  %2649 = vmatpush3.bf16.msra.mxu1 %v2683_v1  ;;  %v2688_v6 = vld [vmem:[%s3748_s3 + $0x60] sm:$0xff]   ;;  %v2690_v8 = vld [vmem:[%s3748_s3 + $0x58] sm:$0xff]   ;;  %s3030_s12 = scalar_lea.vmem %s3746_s1, %s3021_s25  ;;  %v2692_v10 = vld [vmem:[%s3748_s3 + $0x50] sm:$0xff]   ;;  %s3088_s10 = scalar_lea.vmem %s3747_s2, %s3021_s25 }
   0xf   : > { %2515 = vmatprep.subr.bf16.mxu0 %v2684_v2  ;;  %2642 = vmatprep.subr.bf16.mxu1 %v2684_v2  ;;  %v2689_v7 = vld [vmem:[%s3748_s3 + $0x20] sm:$0xff]   ;;  %v2691_v9 = vld [vmem:[%s3748_s3 + $0x18] sm:$0xff]   ;;  %v2693_v12 = vld [vmem:[%s3748_s3 + $0x10] sm:$0xff]   ;;  %s3176_s27 = scalar_lea.vmem %s3745_s0, %s2493_s24  ;;  %s3617_s16 = scalar_lea.vmem %s3753_s8, %s3021_s25 }
  0x10   : > { %v2700_v11 = vld [vmem:[%s3030_s12 + $0x4] ss:$8 sps:$4 sm:$0xff]   ;;  %v2698_v18 = vld [vmem:[%s3030_s12] ss:$8 sps:$4 sm:$0xff]   ;;  %v2701_v19 = vld [vmem:[%s3030_s12 + $0x14] ss:$8 sps:$4 sm:$0xff]  }
  0x11   : > { %682 = vmatprep.mubr.bf16.mxu0 %v2700_v11  ;;  %v2694_v13 = vld [vmem:[%s3748_s3 + $0x48] sm:$0xff]   ;;  %v2696_v16 = vld [vmem:[%s3748_s3 + $0x40] sm:$0xff]   ;;  %v2713_v20 = vld [vmem:[%s3749_s4 + $0x78] sm:$0xff]  }
  0x12   : > { %2516 = vmatpush3.bf16.msra.mxu0 %v2685_v3  ;;  %2650 = vmatpush3.bf16.msra.mxu1 %v2685_v3  ;;  %v2712_v14 = vld [vmem:[%s3030_s12 + $0x44] ss:$8 sps:$4 sm:$0xff]   ;;  %v2710_v21 = vld [vmem:[%s3030_s12 + $0x40] ss:$8 sps:$4 sm:$0xff]   ;;  %v2714_v22 = vld [vmem:[%s3749_s4 + $0x38] sm:$0xff]  }
  0x13   : > { %2517 = vmatprep.subr.bf16.mxu0 %v2686_v4  ;;  %2643 = vmatprep.subr.bf16.mxu1 %v2686_v4  ;;  %v2695_v15 = vld [vmem:[%s3748_s3 + $0x8] sm:$0xff]   ;;  %v2697_v17 = vld [vmem:[%s3748_s3] sm:$0xff]   ;;  %v2717_v23 = vld [vmem:[%s3030_s12 + $0x54] ss:$8 sps:$4 sm:$0xff]  }
  0x14   : > { %714 = vmatprep.mubr.bf16.mxu1 %v2712_v14  ;;  %v2715_v24 = vld [vmem:[%s3749_s4 + $0x70] sm:$0xff]   ;;  %v2720_v27 = vld [vmem:[%s3749_s4 + $0x68] sm:$0xff]   ;;  %v2722_v32 = vld [vmem:[%s3749_s4 + $0x60] sm:$0xff]  }
  0x15   : > { %v2703_v25 = vld [vmem:[%s3030_s12 + $0x10] ss:$8 sps:$4 sm:$0xff]   ;;  %v2704_v28 = vld [vmem:[%s3030_s12 + $0x24] ss:$8 sps:$4 sm:$0xff]   ;;  %v2706_v35 = vld [vmem:[%s3030_s12 + $0x20] ss:$8 sps:$4 sm:$0xff]  }
  0x16   : > { %2518 = vmatpush3.bf16.msra.mxu0 %v2687_v5  ;;  %2651 = vmatpush3.bf16.msra.mxu1 %v2687_v5  ;;  %v2716_v26 = vld [vmem:[%s3749_s4 + $0x30] sm:$0xff]   ;;  %v2721_v30 = vld [vmem:[%s3749_s4 + $0x28] sm:$0xff]   ;;  %v2723_v33 = vld [vmem:[%s3749_s4 + $0x20] sm:$0xff]  }
  0x17   : > { %2519 = vmatprep.subr.bf16.mxu0 %v2688_v6  ;;  %2644 = vmatprep.subr.bf16.mxu1 %v2688_v6  ;;  %v2719_v29 = vld [vmem:[%s3030_s12 + $0x50] ss:$8 sps:$4 sm:$0xff]   ;;  %v2724_v31 = vld [vmem:[%s3030_s12 + $0x64] ss:$8 sps:$4 sm:$0xff]   ;;  %v2707_v36 = vld [vmem:[%s3030_s12 + $0x34] ss:$8 sps:$4 sm:$0xff]  }
  0x18   : > { %v2727_v34 = vld [vmem:[%s3749_s4 + $0x58] sm:$0xff]   ;;  %v2726_v37 = vld [vmem:[%s3030_s12 + $0x60] ss:$8 sps:$4 sm:$0xff]   ;;  %v2729_v40 = vld [vmem:[%s3749_s4 + $0x50] sm:$0xff]  }
  0x19   : > { %v2728_v38 = vld [vmem:[%s3749_s4 + $0x18] sm:$0xff]   ;;  %v2730_v42 = vld [vmem:[%s3749_s4 + $0x10] sm:$0xff]   ;;  %v2734_v44 = vld [vmem:[%s3749_s4 + $0x48] sm:$0xff]  }
  0x1a   : > { %2520 = vmatpush3.bf16.msra.mxu0 %v2689_v7  ;;  %2652 = vmatpush3.bf16.msra.mxu1 %v2689_v7  ;;  %v2731_v39 = vld [vmem:[%s3030_s12 + $0x74] ss:$8 sps:$4 sm:$0xff]   ;;  %v2709_v41 = vld [vmem:[%s3030_s12 + $0x30] ss:$8 sps:$4 sm:$0xff]   ;;  %v2735_v45 = vld [vmem:[%s3749_s4 + $0x8] sm:$0xff]  }
  0x1b   : > { %2521 = vmatprep.subr.bf16.mxu0 %v2690_v8  ;;  %2645 = vmatprep.subr.bf16.mxu1 %v2690_v8  ;;  %v2733_v43 = vld [vmem:[%s3030_s12 + $0x70] ss:$8 sps:$4 sm:$0xff]   ;;  %v2764_v47 = vld [vmem:[%s3751_s6 + $0x74] ss:$8 sps:$4 sm:$0xff]   ;;  %v2736_v48 = vld [vmem:[%s3749_s4 + $0x40] sm:$0xff]  }
  0x1c   : > { %v2762_v46 = vld [vmem:[%s3751_s6 + $0x70] ss:$8 sps:$4 sm:$0xff]   ;;  %v2740_v49 = vld [vmem:[%s3088_s10 + $0x4] ss:$8 sps:$4 sm:$0xff]   ;;  %v2768_v50 = vld [vmem:[%s3751_s6 + $0x60] ss:$8 sps:$4 sm:$0xff]  }
  0x1d   : > { %v2770_v51 = vld [vmem:[%s3751_s6 + $0x64] ss:$8 sps:$4 sm:$0xff]   ;;  %v2776_v53 = vld [vmem:[%s3751_s6 + $0x54] ss:$8 sps:$4 sm:$0xff]   ;;  %v2774_v55 = vld [vmem:[%s3751_s6 + $0x50] ss:$8 sps:$4 sm:$0xff]  }
  0x1e   : > { %2522 = vmatpush3.bf16.msra.mxu0 %v2691_v9  ;;  %2653 = vmatpush3.bf16.msra.mxu1 %v2691_v9  ;;  %v2737_v52 = vld [vmem:[%s3749_s4] sm:$0xff]   ;;  %v2767_v54 = vld [vmem:[%s3750_s5 + $0x74] ss:$8 sps:$4 sm:$0xff]   ;;  %v2765_v59 = vld [vmem:[%s3750_s5 + $0x70] ss:$8 sps:$4 sm:$0xff]  }
  0x1f   : > { %2523 = vmatprep.subr.bf16.mxu0 %v2692_v10  ;;  %2646 = vmatprep.subr.bf16.mxu1 %v2692_v10  ;;  %v2738_v56 = vld [vmem:[%s3088_s10] ss:$8 sps:$4 sm:$0xff]   ;;  %v2782_v57 = vld [vmem:[%s3751_s6 + $0x44] ss:$8 sps:$4 sm:$0xff]   ;;  %v2741_v58 = vld [vmem:[%s3088_s10 + $0x14] ss:$8 sps:$4 sm:$0xff]  }
  0x20   : > { %v2773_v60 = vld [vmem:[%s3750_s5 + $0x64] ss:$8 sps:$4 sm:$0xff]   ;;  %v2780_v61 = vld [vmem:[%s3751_s6 + $0x40] ss:$8 sps:$4 sm:$0xff]   ;;  %v2788_v63 = vld [vmem:[%s3751_s6 + $0x34] ss:$8 sps:$4 sm:$0xff]  }
  0x21   : > { %v2771_v62 = vld [vmem:[%s3750_s5 + $0x60] ss:$8 sps:$4 sm:$0xff]   ;;  %v2779_v0 = vld [vmem:[%s3750_s5 + $0x54] ss:$8 sps:$4 sm:$0xff]   ;;  %v2786_v1 = vld [vmem:[%s3751_s6 + $0x30] ss:$8 sps:$4 sm:$0xff]  }
  0x22   : > { %2524 = vmatpush3.bf16.msra.mxu0 %v2693_v12  ;;  %2654 = vmatpush3.bf16.msra.mxu1 %v2693_v12  ;;  %v2743_v2 = vld [vmem:[%s3088_s10 + $0x10] ss:$8 sps:$4 sm:$0xff]   ;;  %v2744_v3 = vld [vmem:[%s3088_s10 + $0x24] ss:$8 sps:$4 sm:$0xff]   ;;  %v2783_v6 = vld [vmem:[%s3750_s5 + $0x40] ss:$8 sps:$4 sm:$0xff]  }
  0x23   : > { %2525 = vmatprep.subr.bf16.mxu0 %v2694_v13  ;;  %2647 = vmatprep.subr.bf16.mxu1 %v2694_v13  ;;  %v2777_v4 = vld [vmem:[%s3750_s5 + $0x50] ss:$8 sps:$4 sm:$0xff]   ;;  %v2785_v5 = vld [vmem:[%s3750_s5 + $0x44] ss:$8 sps:$4 sm:$0xff]   ;;  %v2791_v7 = vld [vmem:[%s3750_s5 + $0x34] ss:$8 sps:$4 sm:$0xff]  }
  0x24   : > { %v2746_v8 = vld [vmem:[%s3088_s10 + $0x20] ss:$8 sps:$4 sm:$0xff]   ;;  %v2747_v9 = vld [vmem:[%s3088_s10 + $0x34] ss:$8 sps:$4 sm:$0xff]   ;;  %v2789_v10 = vld [vmem:[%s3750_s5 + $0x30] ss:$8 sps:$4 sm:$0xff]  }
  0x25   : > { %v2749_v11 = vld [vmem:[%s3088_s10 + $0x30] ss:$8 sps:$4 sm:$0xff]   ;;  %v2750_v12 = vld [vmem:[%s3088_s10 + $0x44] ss:$8 sps:$4 sm:$0xff]   ;;  %v2752_v13 = vld [vmem:[%s3088_s10 + $0x40] ss:$8 sps:$4 sm:$0xff]  }
  0x26   : > { %2526 = vmatpush3.bf16.msra.mxu0 %v2695_v15  ;;  %2655 = vmatpush3.bf16.msra.mxu1 %v2695_v15  ;;  %v2753_v14 = vld [vmem:[%s3088_s10 + $0x54] ss:$8 sps:$4 sm:$0xff]   ;;  %v2794_v15 = vld [vmem:[%s3751_s6 + $0x24] ss:$8 sps:$4 sm:$0xff]  }
  0x27   : > { %2527 = vmatprep.subr.bf16.mxu0 %v2696_v16  ;;  %2648 = vmatprep.subr.bf16.mxu1 %v2696_v16  ;;  %v2797_v16 = vld [vmem:[%s3750_s5 + $0x24] ss:$8 sps:$4 sm:$0xff]  }
  0x2a   : > { %2528 = vmatpush3.bf16.msra.mxu0 %v2697_v17  ;;  %2656 = vmatpush3.bf16.msra.mxu1 %v2697_v17  ;;  %v2792_v17 = vld [vmem:[%s3751_s6 + $0x20] ss:$8 sps:$4 sm:$0xff]  }
  0x2b   : > { %2577 = vmatprep.subr.bf16.mxu1 %v2713_v20  ;;  %1236 = vmatprep.subr.bf16.mxu0 %v2764_v47  ;;  %v2803_v20 = vld [vmem:[%s3750_s5 + $0x14] ss:$8 sps:$4 sm:$0xff]  }
  0x2d   : > { %683 = vmatmul.mubr.bf16.vlgmr.msra.gmra.mxu0 %v2698_v18  ;;  %715 = vmatmul.mubr.bf16.vlgmr.msra.gmra.mxu1 %v2710_v21  ;;  %v2795_v18 = vld [vmem:[%s3750_s5 + $0x20] ss:$8 sps:$4 sm:$0xff]   ;;  %v2798_v21 = vld [vmem:[%s3751_s6 + $0x10] ss:$8 sps:$4 sm:$0xff]  }
  0x2e   : > { %690 = vmatprep.mubr.bf16.mxu0 %v2701_v19  ;;  %2578 = vmatpush3.bf16.msra.mxu1 %v2714_v22  ;;  %v2800_v19 = vld [vmem:[%s3751_s6 + $0x14] ss:$8 sps:$4 sm:$0xff]   ;;  %v2801_v22 = vld [vmem:[%s3750_s5 + $0x10] ss:$8 sps:$4 sm:$0xff]  }
  0x2f   : > { %722 = vmatprep.mubr.bf16.mxu1 %v2717_v23  ;;  %2579 = vmatprep.subr.bf16.mxu1 %v2715_v24  ;;  %v2755_v23 = vld [vmem:[%s3088_s10 + $0x50] ss:$8 sps:$4 sm:$0xff]   ;;  %v2756_v24 = vld [vmem:[%s3088_s10 + $0x64] ss:$8 sps:$4 sm:$0xff]  }
  0x30   : > { %1237 = vmatpush1.bf16.msra.mxu0 %v2762_v46 }
  0x31   : > { %1238 = vmatprep.subr.bf16.mxu0 %v2770_v51 }
  0x32   : > { %2580 = vmatpush3.bf16.msra.mxu1 %v2716_v26  ;;  %v2809_v26 = vld [vmem:[%s3750_s5 + $0x4] ss:$8 sps:$4 sm:$0xff]  }
  0x33   : > { %2581 = vmatprep.subr.bf16.mxu1 %v2720_v27  ;;  %v2804_v27 = vld [vmem:[%s3751_s6] ss:$8 sps:$4 sm:$0xff]  }
  0x34   : > { %1239 = vmatpush1.bf16.msra.mxu0 %v2768_v50 }
  0x35   : > { %691 = vmatmul.mubr.bf16.gmra.mxu0 %v2703_v25  ;;  %723 = vmatmul.mubr.bf16.gmra.mxu1 %v2719_v29  ;;  %v2806_v25 = vld [vmem:[%s3751_s6 + $0x4] ss:$8 sps:$4 sm:$0xff]   ;;  %v2930_v29 = vmov 0  }
  0x36   : > { %698 = vmatprep.mubr.bf16.mxu0 %v2704_v28  ;;  %2582 = vmatpush3.bf16.msra.mxu1 %v2721_v30  ;;  %v2807_v28 = vld [vmem:[%s3750_s5] ss:$8 sps:$4 sm:$0xff]  }
  0x37   : > { %730 = vmatprep.mubr.bf16.mxu1 %v2724_v31  ;;  %2583 = vmatprep.subr.bf16.mxu1 %v2722_v32  ;;  %v2758_v30 = vld [vmem:[%s3088_s10 + $0x60] ss:$8 sps:$4 sm:$0xff]   ;;  %v2812_v31 = vld [vmem:[%s3752_s7 + $0x74] ss:$8 sps:$4 sm:$0xff]  }
  0x38   : > { %1240 = vmatprep.subr.bf16.mxu0 %v2776_v53  ;;  %v2759_v32 = vld [vmem:[%s3088_s10 + $0x74] ss:$8 sps:$4 sm:$0xff]  }
  0x39   : > { %1241 = vmatpush1.bf16.msra.mxu0 %v2774_v55 }
  0x3a   : > { %2584 = vmatpush3.bf16.msra.mxu1 %v2723_v33  ;;  %1242 = vmatprep.subr.bf16.mxu0 %v2782_v57  ;;  %v2761_v33 = vld [vmem:[%s3088_s10 + $0x70] ss:$8 sps:$4 sm:$0xff]  }
  0x3b   : > { %2585 = vmatprep.subr.bf16.mxu1 %v2727_v34  ;;  %v2813_v34 = vld [vmem:[%s3176_s27] sm:$0xff]   ;;  %v2810_v57 = vld [vmem:[%s3752_s7 + $0x70] ss:$8 sps:$4 sm:$0xff]  }
  0x3d   : > { %699 = vmatmul.mubr.bf16.gmra.mxu0 %v2706_v35  ;;  %731 = vmatmul.mubr.bf16.gmra.mxu1 %v2726_v37  ;;  %v2817_v35 = vld [vmem:[%s3176_s27 + $0x8] sm:$0xff]   ;;  %v2825_v37 = vld [vmem:[%s3176_s27 + $0x18] sm:$0xff]  }
  0x3e   : > { %706 = vmatprep.mubr.bf16.mxu0 %v2707_v36  ;;  %2586 = vmatpush3.bf16.msra.mxu1 %v2728_v38  ;;  %v2821_v36 = vld [vmem:[%s3176_s27 + $0x10] sm:$0xff]   ;;  %v2829_v38 = vld [vmem:[%s3176_s27 + $0x20] sm:$0xff]  }
  0x3f   : > { %738 = vmatprep.mubr.bf16.mxu1 %v2731_v39  ;;  %2587 = vmatprep.subr.bf16.mxu1 %v2729_v40  ;;  %v2833_v39 = vld [vmem:[%s3176_s27 + $0x28] sm:$0xff]   ;;  %v2837_v40 = vld [vmem:[%s3176_s27 + $0x30] sm:$0xff]  }
  0x40   : > { %1243 = vmatpush1.bf16.msra.mxu0 %v2780_v61 }
  0x41   : > { %1244 = vmatprep.subr.bf16.mxu0 %v2788_v63 }
  0x42   : > { %2588 = vmatpush3.bf16.msra.mxu1 %v2730_v42 }
  0x43   : > { %2589 = vmatprep.subr.bf16.mxu1 %v2734_v44 }
  0x44   : > { %1245 = vmatpush1.bf16.msra.mxu0 %v2786_v1  ;;  %v2814_v1 = vld [vmem:[%s3752_s7 + $0x60] ss:$8 sps:$4 sm:$0xff]  }
  0x45   : > { %707 = vmatmul.mubr.bf16.gmra.mxu0 %v2709_v41  ;;  %739 = vmatmul.mubr.bf16.gmra.mxu1 %v2733_v43  ;;  %v2841_v41 = vld [vmem:[%s3176_s27 + $0x38] sm:$0xff]  }
  0x46   : > { %2590 = vmatpush3.bf16.msra.mxu1 %v2735_v45  ;;  %1019 = vmatprep.mubr.bf16.mxu1 %v2740_v49 }
  0x47   : > { %2591 = vmatprep.subr.bf16.mxu1 %v2736_v48  ;;  %1246 = vmatprep.subr.bf16.mxu0 %v2794_v15 }
  0x48   : > { %1247 = vmatpush1.bf16.msra.mxu0 %v2792_v17  ;;  %1268 = vmatprep.mubr.bf16.mxu0 %v2930_v29 }
  0x49   : > { %1248 = vmatprep.subr.bf16.mxu0 %v2800_v19 }
  0x4a   : > { %2592 = vmatpush3.bf16.msra.mxu1 %v2737_v52 }
  0x4b   : > { %1477 = vmatprep.subr.bf16.mxu1 %v2767_v54 }
  0x4c   : > { %1249 = vmatpush1.bf16.msra.mxu0 %v2798_v21 }
  0x4d   : > { %1020 = vmatmul.mubr.bf16.vlgmr.msra.gmra.mxu1 %v2738_v56  ;;  %1250 = vmatprep.subr.bf16.mxu0 %v2806_v25 }
  0x4e   : > { %1027 = vmatprep.mubr.bf16.mxu1 %v2741_v58  ;;  %1478 = vmatpush1.bf16.msra.mxu1 %v2765_v59  ;;  %v2816_v59 = vld [vmem:[%s3752_s7 + $0x64] ss:$8 sps:$4 sm:$0xff]  }
  0x4f   : > { %1479 = vmatprep.subr.bf16.mxu1 %v2773_v60 }
  0x50   : > { %1251 = vmatpush1.bf16.msra.mxu0 %v2804_v27  ;;  %v2826_v27 = vld [vmem:[%s3752_s7 + $0x30] ss:$8 sps:$4 sm:$0xff]  }
  0x51   : > { %1694 = vmatprep.subr.bf16.mxu0 %v2812_v31  ;;  %v2832_v31 = vld [vmem:[%s3752_s7 + $0x24] ss:$8 sps:$4 sm:$0xff]  }
  0x52   : > { %1480 = vmatpush1.bf16.msra.mxu1 %v2771_v62 }
  0x53   : > { %1481 = vmatprep.subr.bf16.mxu1 %v2779_v0 }
  0x55   : > { %1028 = vmatmul.mubr.bf16.gmra.mxu1 %v2743_v2 }
  0x56   : > { %1035 = vmatprep.mubr.bf16.mxu1 %v2744_v3  ;;  %1482 = vmatpush1.bf16.msra.mxu1 %v2777_v4  ;;  %v2820_v3 = vld [vmem:[%s3752_s7 + $0x54] ss:$8 sps:$4 sm:$0xff]  }
  0x57   : > { %1483 = vmatprep.subr.bf16.mxu1 %v2785_v5 }
  0x5a   : > { %1484 = vmatpush1.bf16.msra.mxu1 %v2783_v6 }
  0x5b   : > { %1485 = vmatprep.subr.bf16.mxu1 %v2791_v7 }
  0x5d   : > { %1036 = vmatmul.mubr.bf16.gmra.mxu1 %v2746_v8 }
  0x5e   : > { %1043 = vmatprep.mubr.bf16.mxu1 %v2747_v9  ;;  %1486 = vmatpush1.bf16.msra.mxu1 %v2789_v10  ;;  %v2818_v10 = vld [vmem:[%s3752_s7 + $0x50] ss:$8 sps:$4 sm:$0xff]  }
  0x5f   : > { %1487 = vmatprep.subr.bf16.mxu1 %v2797_v16 }
  0x62   : > { %1488 = vmatpush1.bf16.msra.mxu1 %v2795_v18  ;;  %v2822_v18 = vld [vmem:[%s3752_s7 + $0x40] ss:$8 sps:$4 sm:$0xff]  }
  0x63   : > { %1489 = vmatprep.subr.bf16.mxu1 %v2803_v20  ;;  %v2828_v20 = vld [vmem:[%s3752_s7 + $0x34] ss:$8 sps:$4 sm:$0xff]  }
  0x65   : > { %1044 = vmatmul.mubr.bf16.gmra.mxu1 %v2749_v11 }
  0x66   : > { %1051 = vmatprep.mubr.bf16.mxu1 %v2750_v12  ;;  %1490 = vmatpush1.bf16.msra.mxu1 %v2801_v22  ;;  %v2824_v12 = vld [vmem:[%s3752_s7 + $0x44] ss:$8 sps:$4 sm:$0xff]  }
  0x67   : > { %1491 = vmatprep.subr.bf16.mxu1 %v2809_v26 }
  0x6a   : > { %1492 = vmatpush1.bf16.msra.mxu1 %v2807_v28 }
  0x6d   : > { %1052 = vmatmul.mubr.bf16.gmra.mxu1 %v2752_v13 }
  0x6e   : > { %1059 = vmatprep.mubr.bf16.mxu1 %v2753_v14 }
  0x75   : > { %1060 = vmatmul.mubr.bf16.gmra.mxu1 %v2755_v23 }
  0x76   : > { %1067 = vmatprep.mubr.bf16.mxu1 %v2756_v24 }
  0x7d   : > { %1068 = vmatmul.mubr.bf16.gmra.mxu1 %v2758_v30 }
  0x7e   : > { %1075 = vmatprep.mubr.bf16.mxu1 %v2759_v32 }
  0x85   : > { %1076 = vmatmul.mubr.bf16.gmra.mxu1 %v2761_v33 }
  0x86   : > { %1509 = vmatprep.mubr.bf16.mxu1 %v2930_v29 }
  0x8d   : > { %1510 = vmatmul.mubr.bf16.vlgmr.msra.gmra.mxu1 %v2813_v34 }
  0x8e   : > { %1519 = vmatprep.mubr.bf16.mxu1 %v2930_v29 }
  0x95   : > { %1520 = vmatmul.mubr.bf16.gmra.mxu1 %v2817_v35 }
  0x96   : > { %1529 = vmatprep.mubr.bf16.mxu1 %v2930_v29 }
  0x9d   : > { %1530 = vmatmul.mubr.bf16.gmra.mxu1 %v2821_v36  ;;  %v2830_v36 = vld [vmem:[%s3752_s7 + $0x20] ss:$8 sps:$4 sm:$0xff]  }
  0x9e   : > { %1539 = vmatprep.mubr.bf16.mxu1 %v2930_v29 }
  0xa5   : > { %1540 = vmatmul.mubr.bf16.gmra.mxu1 %v2825_v37 }
  0xa6   : > { %1549 = vmatprep.mubr.bf16.mxu1 %v2930_v29 }
  0xad   : > { %1550 = vmatmul.mubr.bf16.gmra.mxu1 %v2829_v38 }
  0xae   : > { %1559 = vmatprep.mubr.bf16.mxu1 %v2930_v29 }
  0xb5   : > { %1560 = vmatmul.mubr.bf16.gmra.mxu1 %v2833_v39  ;;  %v2836_v39 = vld [vmem:[%s3752_s7 + $0x14] ss:$8 sps:$4 sm:$0xff]  }
  0xb6   : > { %1569 = vmatprep.mubr.bf16.mxu1 %v2930_v29 }
  0xbd   : > { %1570 = vmatmul.mubr.bf16.gmra.mxu1 %v2837_v40 }
  0xbe   : > { %1579 = vmatprep.mubr.bf16.mxu1 %v2930_v29 }
  0xc5   : > { %1580 = vmatmul.mubr.bf16.gmra.mxu1 %v2841_v41 }
  0xed   : > { %v2529_v42 = vpop.f32.mrf.mxu0  ;;  %v3261_v43 = vpop.f32.mrf.mxu1 }
  0xef   : > { %v2530_v44 = vpop.f32.mrf.mxu0  ;;  %v3263_v45 = vpop.f32.mrf.mxu1 }
  0xf0   : > { %v2531_v47 = vadd.f32 %v2530_v44, %v2529_v42  ;;  %v2834_v44 = vld [vmem:[%s3752_s7 + $0x10] ss:$8 sps:$4 sm:$0xff]  }
  0xf1   : > { %v2532_v46 = vpop.f32.mrf.mxu0  ;;  %v3265_v48 = vpop.f32.mrf.mxu1 }
  0xf2   : > { %v747_v53 = vmax.f32 %v2531_v47, 0.0 }
  0xf3   : > { %v2533_v49 = vpop.f32.mrf.mxu0  ;;  %v3267_v51 = vpop.f32.mrf.mxu1 }
  0xf4   : > { %v2534_v50 = vadd.f32 %v2533_v49, %v2532_v46  ;;  %v2555_v46 = vadd.f32 %v3263_v45, %v3261_v43  ;;  %v2558_v49 = vadd.f32 %v3267_v51, %v3265_v48 }
  0xf5   : > { %v2535_v52 = vpop.f32.mrf.mxu0  ;;  %v3269_v55 = vpop.f32.mrf.mxu1 }
  0xf6   : > { %v748_v54 = vmax.f32 %v2534_v50, 0.0  ;;  %v755_v43 = vmax.f32 %v2555_v46, 0.0  ;;  %v756_v45 = vmax.f32 %v2558_v49, 0.0 }
  0xf7   : > { %v2536_v56 = vpop.f32.mrf.mxu0  ;;  %v3277_v60 = vpop.f32.mrf.mxu1 }
  0xf8   : > { %v1132_v58 = vpack.c.bf16 %v748_v54, %v747_v53  ;;  %v2537_v62 = vadd.f32 %v2536_v56, %v2535_v52  ;;  %v2840_v52 = vld [vmem:[%s3752_s7 + $0x4] ss:$8 sps:$4 sm:$0xff]   ;;  %v2838_v54 = vld [vmem:[%s3752_s7] ss:$8 sps:$4 sm:$0xff]   ;;  %v1136_v51 = vpack.c.bf16 %v756_v45, %v755_v43 }
  0xf9   : > { %v2538_v61 = vpop.f32.mrf.mxu0  ;;  %v3279_v63 = vpop.f32.mrf.mxu1 }
  0xfa   : > { %1269 = vmatmul.mubr.bf16.vlgmr.msra.gmra.mxu0 %v1132_v58  ;;  %v749_v6 = vmax.f32 %v2537_v62, 0.0 }
  0xfb   : > { %1695 = vmatpush1.bf16.msra.mxu0 %v2810_v57  ;;  %v2539_v0 = vpop.f32.mrf.mxu0  ;;  %1278 = vmatprep.mubr.bf16.mxu0 %v2930_v29  ;;  %v3288_v4 = vpop.f32.mrf.mxu1  ;;  %v2561_v57 = vadd.f32 %v3277_v60, %v3269_v55 }
  0xfc   : > { %v2540_v2 = vadd.f32 %v2539_v0, %v2538_v61  ;;  %1696 = vmatprep.subr.bf16.mxu0 %v2816_v59  ;;  %v2564_v58 = vadd.f32 %v3288_v4, %v3279_v63 }
  0xfd   : > { %v2541_v5 = vpop.f32.mrf.mxu0  ;;  %v3290_v8 = vpop.f32.mrf.mxu1  ;;  %v757_v62 = vmax.f32 %v2561_v57, 0.0 }
  0xfe   : > { %v750_v7 = vmax.f32 %v2540_v2, 0.0  ;;  %v758_v0 = vmax.f32 %v2564_v58, 0.0 }
  0xff   : > { %v2542_v9 = vpop.f32.mrf.mxu0  ;;  %1697 = vmatpush1.bf16.msra.mxu0 %v2814_v1  ;;  %v3298_v13 = vpop.f32.mrf.mxu1 }
 0x100   : > { %v1133_v11 = vpack.c.bf16 %v750_v7, %v749_v6  ;;  %1698 = vmatprep.subr.bf16.mxu0 %v2820_v3  ;;  %v2543_v15 = vadd.f32 %v2542_v9, %v2541_v5  ;;  %v1137_v3 = vpack.c.bf16 %v758_v0, %v757_v62  ;;  %v2567_v5 = vadd.f32 %v3298_v13, %v3290_v8 }
 0x101   : > { %v2544_v14 = vpop.f32.mrf.mxu0  ;;  %v3300_v16 = vpop.f32.mrf.mxu1 }
 0x102   : > { %1279 = vmatmul.mubr.bf16.gmra.mxu0 %v1133_v11  ;;  %v751_v23 = vmax.f32 %v2543_v15, 0.0  ;;  %v759_v60 = vmax.f32 %v2567_v5, 0.0 }
 0x103   : > { %v2545_v17 = vpop.f32.mrf.mxu0  ;;  %1288 = vmatprep.mubr.bf16.mxu0 %v2930_v29  ;;  %1699 = vmatpush1.bf16.msra.mxu0 %v2818_v10  ;;  %v2569_v21 = vpop.f32.mrf.mxu1 }
 0x104   : > { %v2546_v19 = vadd.f32 %v2545_v17, %v2544_v14  ;;  %1700 = vmatprep.subr.bf16.mxu0 %v2824_v12  ;;  %v2570_v6 = vadd.f32 %v2569_v21, %v3300_v16 }
 0x105   : > { %v2547_v22 = vpop.f32.mrf.mxu0  ;;  %v3309_v25 = vpop.f32.mrf.mxu1 }
 0x106   : > { %v752_v24 = vmax.f32 %v2546_v19, 0.0  ;;  %v760_v63 = vmax.f32 %v2570_v6, 0.0 }
 0x107   : > { %v2548_v26 = vpop.f32.mrf.mxu0  ;;  %1701 = vmatpush1.bf16.msra.mxu0 %v2822_v18  ;;  %v2572_v30 = vpop.f32.mrf.mxu1 }
 0x108   : > { %v1134_v28 = vpack.c.bf16 %v752_v24, %v751_v23  ;;  %1702 = vmatprep.subr.bf16.mxu0 %v2828_v20  ;;  %v2549_v33 = vadd.f32 %v2548_v26, %v2547_v22  ;;  %v1138_v10 = vpack.c.bf16 %v760_v63, %v759_v60  ;;  %v2573_v11 = vadd.f32 %v2572_v30, %v3309_v25 }
 0x109   : > { %v2550_v32 = vpop.f32.mrf.mxu0  ;;  %v2574_v34 = vpop.f32.mrf.mxu1 }
 0x10a   : > { %1289 = vmatmul.mubr.bf16.gmra.mxu0 %v1134_v28  ;;  %v753_v40 = vmax.f32 %v2549_v33, 0.0  ;;  %v761_v8 = vmax.f32 %v2573_v11, 0.0 }
 0x10b   : > { %v2551_v35 = vpop.f32.mrf.mxu0  ;;  %1298 = vmatprep.mubr.bf16.mxu0 %v2930_v29  ;;  %1703 = vmatpush1.bf16.msra.mxu0 %v2826_v27  ;;  %v2575_v38 = vpop.f32.mrf.mxu1 }
 0x10c   : > { %v2552_v37 = vadd.f32 %v2551_v35, %v2550_v32  ;;  %1704 = vmatprep.subr.bf16.mxu0 %v2832_v31  ;;  %v2576_v12 = vadd.f32 %v2575_v38, %v2574_v34 }
 0x10d   : > { %v2593_v42 = vpop.f32.mrf.mxu1 }
 0x10e   : > { %v754_v41 = vmax.f32 %v2552_v37, 0.0  ;;  %v762_v13 = vmax.f32 %v2576_v12, 0.0 }
 0x10f   : > { %1705 = vmatpush1.bf16.msra.mxu0 %v2830_v36  ;;  %v2594_v50 = vpop.f32.mrf.mxu1 }
 0x110   : > { %v1135_v47 = vpack.c.bf16 %v754_v41, %v753_v40  ;;  %1706 = vmatprep.subr.bf16.mxu0 %v2836_v39  ;;  %v1139_v18 = vpack.c.bf16 %v762_v13, %v761_v8  ;;  %v2595_v19 = vadd.f32 %v2594_v50, %v2593_v42 }
 0x111   : > { %v2596_v53 = vpop.f32.mrf.mxu1 }
 0x112   : > { %1299 = vmatmul.mubr.bf16.gmra.mxu0 %v1135_v47  ;;  %v1084_v23 = vmax.f32 %v2595_v19, 0.0 }
 0x113   : > { %1308 = vmatprep.mubr.bf16.mxu0 %v2930_v29  ;;  %1707 = vmatpush1.bf16.msra.mxu0 %v2834_v44  ;;  %v2597_v56 = vpop.f32.mrf.mxu1 }
 0x114   : > { %1708 = vmatprep.subr.bf16.mxu0 %v2840_v52  ;;  %v2598_v20 = vadd.f32 %v2597_v56, %v2596_v53 }
 0x115   : > { %v2599_v48 = vpop.f32.mrf.mxu1 }
 0x116   : > { %v1085_v24 = vmax.f32 %v2598_v20, 0.0 }
 0x117   : > { %1709 = vmatpush1.bf16.msra.mxu0 %v2838_v54  ;;  %v2600_v59 = vpop.f32.mrf.mxu1 }
 0x118   : > { %v1590_v26 = vpack.c.bf16 %v1085_v24, %v1084_v23  ;;  %v2601_v27 = vadd.f32 %v2600_v59, %v2599_v48 }
 0x119   : > { %v2602_v61 = vpop.f32.mrf.mxu1 }
 0x11a   : > { %1309 = vmatmul.mubr.bf16.gmra.mxu0 %v1136_v51  ;;  %v1086_v31 = vmax.f32 %v2601_v27, 0.0 }
 0x11b   : > { %1318 = vmatprep.mubr.bf16.mxu0 %v2930_v29  ;;  %v2603_v1 = vpop.f32.mrf.mxu1 }
 0x11c   : > { %v2604_v28 = vadd.f32 %v2603_v1, %v2602_v61 }
 0x11d   : > { %v2605_v2 = vpop.f32.mrf.mxu1 }
 0x11e   : > { %v1087_v32 = vmax.f32 %v2604_v28, 0.0 }
 0x11f   : > { %v2606_v7 = vpop.f32.mrf.mxu1 }
 0x120   : > { %v1591_v34 = vpack.c.bf16 %v1087_v32, %v1086_v31  ;;  %v2607_v35 = vadd.f32 %v2606_v7, %v2605_v2 }
 0x121   : > { %v2608_v55 = vpop.f32.mrf.mxu1 }
 0x122   : > { %1319 = vmatmul.mubr.bf16.gmra.mxu0 %v1137_v3  ;;  %v1088_v38 = vmax.f32 %v2607_v35, 0.0 }
 0x123   : > { %1328 = vmatprep.mubr.bf16.mxu0 %v2930_v29  ;;  %v2609_v4 = vpop.f32.mrf.mxu1 }
 0x124   : > { %v2610_v36 = vadd.f32 %v2609_v4, %v2608_v55 }
 0x125   : > { %v2611_v9 = vpop.f32.mrf.mxu1 }
 0x126   : > { %v1089_v39 = vmax.f32 %v2610_v36, 0.0 }
 0x127   : > { %v2612_v14 = vpop.f32.mrf.mxu1 }
 0x128   : > { %v1592_v41 = vpack.c.bf16 %v1089_v39, %v1088_v38  ;;  %v2613_v42 = vadd.f32 %v2612_v14, %v2611_v9 }
 0x129   : > { %v2614_v15 = vpop.f32.mrf.mxu1 }
 0x12a   : > { %1329 = vmatmul.mubr.bf16.gmra.mxu0 %v1138_v10  ;;  %v1090_v47 = vmax.f32 %v2613_v42, 0.0 }
 0x12b   : > { %1338 = vmatprep.mubr.bf16.mxu0 %v2930_v29  ;;  %v2615_v16 = vpop.f32.mrf.mxu1 }
 0x12c   : > { %v2616_v44 = vadd.f32 %v2615_v16, %v2614_v15 }
 0x12d   : > { %v2617_v17 = vpop.f32.mrf.mxu1 }
 0x12e   : > { %v1091_v49 = vmax.f32 %v2616_v44, 0.0 }
 0x12f   : > { %v2618_v21 = vpop.f32.mrf.mxu1 }
 0x130   : > { %v1593_v52 = vpack.c.bf16 %v1091_v49, %v1090_v47  ;;  %v2619_v53 = vadd.f32 %v2618_v21, %v2617_v17 }
 0x131   : > { %v2620_v22 = vpop.f32.mrf.mxu1 }
 0x132   : > { %1339 = vmatmul.mubr.bf16.gmra.mxu0 %v1139_v18  ;;  %v1092_v45 = vmax.f32 %v2619_v53, 0.0 }
 0x133   : > { %1726 = vmatprep.mubr.bf16.mxu0 %v2930_v29  ;;  %v2621_v25 = vpop.f32.mrf.mxu1 }
 0x134   : > { %v2622_v54 = vadd.f32 %v2621_v25, %v2620_v22 }
 0x135   : > { %v2623_v30 = vpop.f32.mrf.mxu1 }
 0x136   : > { %v1093_v56 = vmax.f32 %v2622_v54, 0.0 }
 0x137   : > { %v2624_v33 = vpop.f32.mrf.mxu1 }
 0x138   : > { %v1594_v51 = vpack.c.bf16 %v1093_v56, %v1092_v45  ;;  %v2625_v57 = vadd.f32 %v2624_v33, %v2623_v30 }
 0x139   : > { %v2626_v37 = vpop.f32.mrf.mxu1 }
 0x13a   : > { %1727 = vmatmul.mubr.bf16.vlgmr.msra.gmra.mxu0 %v1590_v26  ;;  %v1094_v61 = vmax.f32 %v2625_v57, 0.0 }
 0x13b   : > { %1736 = vmatprep.mubr.bf16.mxu0 %v2930_v29  ;;  %v2627_v40 = vpop.f32.mrf.mxu1 }
 0x13c   : > { %v2628_v58 = vadd.f32 %v2627_v40, %v2626_v37 }
 0x13d   : > { %v2629_v46 = vpop.f32.mrf.mxu1 }
 0x13e   : > { %v1095_v62 = vmax.f32 %v2628_v58, 0.0 }
 0x13f   : > { %v2630_v50 = vpop.f32.mrf.mxu1 }
 0x140   : > { %v1595_v1 = vpack.c.bf16 %v1095_v62, %v1094_v61  ;;  %v2631_v2 = vadd.f32 %v2630_v50, %v2629_v46 }
 0x141   : > { %v2632_v43 = vpop.f32.mrf.mxu1 }
 0x142   : > { %1737 = vmatmul.mubr.bf16.gmra.mxu0 %v1591_v34  ;;  %v1096_v6 = vmax.f32 %v2631_v2, 0.0 }
 0x143   : > { %1746 = vmatprep.mubr.bf16.mxu0 %v2930_v29  ;;  %v2633_v48 = vpop.f32.mrf.mxu1 }
 0x144   : > { %v2634_v3 = vadd.f32 %v2633_v48, %v2632_v43 }
 0x145   : > { %v2635_v59 = vpop.f32.mrf.mxu1 }
 0x146   : > { %v1097_v7 = vmax.f32 %v2634_v3, 0.0 }
 0x147   : > { %v2636_v0 = vpop.f32.mrf.mxu1 }
 0x148   : > { %v1596_v60 = vpack.c.bf16 %v1097_v7, %v1096_v6  ;;  %v2637_v63 = vadd.f32 %v2636_v0, %v2635_v59 }
 0x149   : > { %v2638_v5 = vpop.f32.mrf.mxu1 }
 0x14a   : > { %1747 = vmatmul.mubr.bf16.gmra.mxu0 %v1592_v41  ;;  %v1098_v9 = vmax.f32 %v2637_v63, 0.0 }
 0x14b   : > { %1756 = vmatprep.mubr.bf16.mxu0 %v2930_v29  ;;  %v2639_v55 = vpop.f32.mrf.mxu1 }
 0x14c   : > { %v2640_v4 = vadd.f32 %v2639_v55, %v2638_v5 }
 0x14d   : > { %v1511_v12 = vpop.f32.mrf.mxu1 }
 0x14e   : > { %v1099_v10 = vmax.f32 %v2640_v4, 0.0 }
 0x14f   : > { %v1513_v8 = vpop.f32.mrf.mxu1 }
 0x150   : > { %v1597_v11 = vpack.c.bf16 %v1099_v10, %v1098_v9 }
 0x151   : > { %v1515_v16 = vpop.f32.mrf.mxu1 }
 0x152   : > { %1757 = vmatmul.mubr.bf16.gmra.mxu0 %v1593_v52 }
 0x153   : > { %1766 = vmatprep.mubr.bf16.mxu0 %v2930_v29  ;;  %v1517_v19 = vpop.f32.mrf.mxu1 }
 0x155   : > { %v1521_v22 = vpop.f32.mrf.mxu1 }
 0x157   : > { %v1523_v24 = vpop.f32.mrf.mxu1 }
 0x159   : > { %v1525_v27 = vpop.f32.mrf.mxu1 }
 0x15a   : > { %1767 = vmatmul.mubr.bf16.gmra.mxu0 %v1594_v51 }
 0x15b   : > { %1776 = vmatprep.mubr.bf16.mxu0 %v2930_v29  ;;  %v1527_v31 = vpop.f32.mrf.mxu1 }
 0x15d   : > { %v3375_v34 = vpop.f32.mrf.mxu1 }
 0x15f   : > { %v3381_v37 = vpop.f32.mrf.mxu1 }
 0x161   : > { %v3387_v40 = vpop.f32.mrf.mxu1 }
 0x162   : > { %1777 = vmatmul.mubr.bf16.gmra.mxu0 %v1595_v1 }
 0x163   : > { %1786 = vmatprep.mubr.bf16.mxu0 %v2930_v29  ;;  %v3393_v44 = vpop.f32.mrf.mxu1 }
 0x165   : > { %v3399_v49 = vpop.f32.mrf.mxu1 }
 0x167   : > { %v3405_v53 = vpop.f32.mrf.mxu1 }
 0x169   : > { %v3411_v45 = vpop.f32.mrf.mxu1 }
 0x16a   : > { %1787 = vmatmul.mubr.bf16.gmra.mxu0 %v1596_v60 }
 0x16b   : > { %1796 = vmatprep.mubr.bf16.mxu0 %v2930_v29  ;;  %v3417_v51 = vpop.f32.mrf.mxu1 }
 0x16d   : > { %v3423_v59 = vpop.f32.mrf.mxu1 }
 0x16f   : > { %v3429_v3 = vpop.f32.mrf.mxu1 }
 0x171   : > { %v3439_v10 = vpop.f32.mrf.mxu1 }
 0x172   : > { %1797 = vmatmul.mubr.bf16.gmra.mxu0 %v1597_v11 }
 0x1ba   : > { %v1270_v14 = vpop.f32.mrf.mxu0 }
 0x1bb   : > { %v1512_v62 = vadd.f32 %v1511_v12, %v1270_v14 }
 0x1bc   : > { %v1272_v15 = vpop.f32.mrf.mxu0 }
 0x1bd   : > { %v1514_v1 = vadd.f32 %v1513_v8, %v1272_v15 }
 0x1be   : > { %v1274_v13 = vpop.f32.mrf.mxu0 }
 0x1bf   : > { %v1516_v6 = vadd.f32 %v1515_v16, %v1274_v13 }
 0x1c0   : > { %v1276_v17 = vpop.f32.mrf.mxu0 }
 0x1c1   : > { %v1518_v60 = vadd.f32 %v1517_v19, %v1276_v17 }
 0x1c2   : > { %v1280_v18 = vpop.f32.mrf.mxu0 }
 0x1c3   : > { %v1522_v12 = vadd.f32 %v1521_v22, %v1280_v18 }
 0x1c4   : > { %v1282_v20 = vpop.f32.mrf.mxu0 }
 0x1c5   : > { %v1524_v13 = vadd.f32 %v1523_v24, %v1282_v20 }
 0x1c6   : > { %v3357_v21 = vpop.f32.mrf.mxu0 }
 0x1c8   : > { %v3359_v23 = vpop.f32.mrf.mxu0 }
 0x1c9   : > { %v1528_v20 = vadd.f32 %v1527_v31, %v3359_v23 }
 0x1ca   : > { %v3361_v29 = vpop.f32.mrf.mxu0 }
 0x1cc   : > { %v3363_v25 = vpop.f32.mrf.mxu0 }
 0x1cd   : > { %v1534_v23 = vadd.f32 %v3381_v37, %v3363_v25 }
 0x1ce   : > { %v3365_v26 = vpop.f32.mrf.mxu0 }
 0x1d0   : > { %v3367_v28 = vpop.f32.mrf.mxu0 }
 0x1d1   : > { %v1538_v25 = vadd.f32 %v3393_v44, %v3367_v28 }
 0x1d2   : > { %v3369_v30 = vpop.f32.mrf.mxu0 }
 0x1d4   : > { %v3371_v32 = vpop.f32.mrf.mxu0 }
 0x1d5   : > { %v1544_v28 = vadd.f32 %v3405_v53, %v3371_v32 }
 0x1d6   : > { %v3373_v33 = vpop.f32.mrf.mxu0 }
 0x1d8   : > { %v3377_v35 = vpop.f32.mrf.mxu0 }
 0x1d9   : > { %v1548_v32 = vadd.f32 %v3417_v51, %v3377_v35 }
 0x1da   : > { %v3379_v36 = vpop.f32.mrf.mxu0 }
 0x1dc   : > { %v3383_v38 = vpop.f32.mrf.mxu0 }
 0x1dd   : > { %v1554_v35 = vadd.f32 %v3429_v3, %v3383_v38 }
 0x1de   : > { %v3385_v39 = vpop.f32.mrf.mxu0 }
 0x1e0   : > { %v3389_v41 = vpop.f32.mrf.mxu0 }
 0x1e2   : > { %v3391_v42 = vpop.f32.mrf.mxu0 }
 0x1e4   : > { %v3395_v46 = vpop.f32.mrf.mxu0 }
 0x1e6   : > { %v3397_v47 = vpop.f32.mrf.mxu0 }
 0x1e8   : > { %v3401_v50 = vpop.f32.mrf.mxu0 }
 0x1ea   : > { %v3403_v52 = vpop.f32.mrf.mxu0 }
 0x1ec   : > { %v3407_v54 = vpop.f32.mrf.mxu0 }
 0x1ee   : > { %v3409_v43 = vpop.f32.mrf.mxu0 }
 0x1f0   : > { %v3413_v56 = vpop.f32.mrf.mxu0 }
 0x1f2   : > { %v3415_v48 = vpop.f32.mrf.mxu0 }
 0x1f4   : > { %v3419_v57 = vpop.f32.mrf.mxu0 }
 0x1f6   : > { %v3421_v58 = vpop.f32.mrf.mxu0 }
 0x1f8   : > { %v3425_v61 = vpop.f32.mrf.mxu0 }
 0x1fa   : > { %v1728_v0 = vpop.f32.mrf.mxu0 }
 0x1fb   : > { %v3427_v2 = vadd.f32 %v1728_v0, %v1512_v62  ;;  %v3449_v62 = vpop.f32.mrf.mxu1 }
 0x1fc   : > { %v1730_v5 = vpop.f32.mrf.mxu0  ;;  %v1558_v38 = vadd.f32 %v3449_v62, %v3389_v41 }
 0x1fd   : > { %v3431_v7 = vadd.f32 %v1730_v5, %v1514_v1  ;;  %v1839_v4 = vmul.f32 %v3427_v2, %v3427_v2  ;;  %v1526_v1 = vadd.f32 %v1525_v27, %v3357_v21  ;;  %v1532_v21 = vadd.f32 %v3375_v34, %v3361_v29 }
 0x1fe   : > { %v1732_v55 = vpop.f32.mrf.mxu0  ;;  %v1536_v29 = vadd.f32 %v3387_v40, %v3365_v26  ;;  %v1542_v26 = vadd.f32 %v3399_v49, %v3369_v30  ;;  %v1546_v30 = vadd.f32 %v3411_v45, %v3373_v33  ;;  %v1552_v33 = vadd.f32 %v3423_v59, %v3379_v36 }
 0x1ff   : > { %v3433_v63 = vadd.f32 %v1732_v55, %v1516_v6  ;;  %v1840_v9 = vmul.f32 %v3431_v7, %v3431_v7  ;;  %v1556_v36 = vadd.f32 %v3439_v10, %v3385_v39 }
 0x200   : > { %v1734_v11 = vpop.f32.mrf.mxu0 }
 0x201   : > { %v3441_v14 = vadd.f32 %v1734_v11, %v1518_v60  ;;  %v1871_v15 = vadd.f32 %v1840_v9, %v1839_v4  ;;  %v1841_v16 = vmul.f32 %v3433_v63, %v3433_v63  ;;  %v3461_v60 = vpop.f32.mrf.mxu1 }
 0x202   : > { %v1738_v8 = vpop.f32.mrf.mxu0  ;;  %v1562_v39 = vadd.f32 %v3461_v60, %v3391_v42 }
 0x203   : > { %v1842_v17 = vmul.f32 %v3441_v14, %v3441_v14  ;;  %v3447_v19 = vadd.f32 %v1738_v8, %v1522_v12  ;;  %1872 = vadd.xlane.f32.xlu0 %v1871_v15  ;;  %v1563_v8 = vpop.f32.mrf.mxu1 }
 0x204   : > { %v1740_v0 = vpop.f32.mrf.mxu0  ;;  %v1564_v41 = vadd.f32 %v1563_v8, %v3395_v46 }
 0x205   : > { %v3452_v18 = vadd.f32 %v1740_v0, %v1524_v13  ;;  %v1874_v22 = vadd.f32 %v1842_v17, %v1841_v16  ;;  %v1843_v6 = vmul.f32 %v3447_v19, %v3447_v19 }
 0x206   : > { %v1742_v5 = vpop.f32.mrf.mxu0 }
 0x207   : > { %v3455_v24 = vadd.f32 %v1742_v5, %v1526_v1  ;;  %1875 = vadd.xlane.f32.xlu0 %v1874_v22  ;;  %v1844_v55 = vmul.f32 %v3452_v18, %v3452_v18  ;;  %v1565_v22 = vpop.f32.mrf.mxu1 }
 0x208   : > { %v1744_v4 = vpop.f32.mrf.mxu0 }
 0x209   : > { %v3465_v27 = vadd.f32 %v1744_v4, %v1528_v20  ;;  %v1877_v9 = vadd.f32 %v1844_v55, %v1843_v6  ;;  %v1845_v31 = vmul.f32 %v3455_v24, %v3455_v24 }
 0x20a   : > { %v1748_v11 = vpop.f32.mrf.mxu0 }
 0x20b   : > { %v1846_v12 = vmul.f32 %v3465_v27, %v3465_v27  ;;  %v3473_v15 = vadd.f32 %v1748_v11, %v1532_v21  ;;  %1878 = vadd.xlane.f32.xlu1 %v1877_v9  ;;  %v1567_v21 = vpop.f32.mrf.mxu1 }
 0x20c   : > { %v1750_v13 = vpop.f32.mrf.mxu0 }
 0x20d   : > { %v3477_v34 = vadd.f32 %v1750_v13, %v1534_v23  ;;  %v1880_v16 = vadd.f32 %v1846_v12, %v1845_v31  ;;  %v1847_v37 = vmul.f32 %v3473_v15, %v3473_v15  ;;  %v1571_v13 = vpop.f32.mrf.mxu1 }
 0x20e   : > { %v1752_v17 = vpop.f32.mrf.mxu0 }
 0x20f   : > { %v1848_v0 = vmul.f32 %v3477_v34, %v3477_v34  ;;  %v3485_v1 = vadd.f32 %v1752_v17, %v1536_v29  ;;  %1881 = vadd.xlane.f32.xlu1 %v1880_v16 }
 0x210   : > { %v1754_v5 = vpop.f32.mrf.mxu0 }
 0x211   : > { %v3489_v40 = vadd.f32 %v1754_v5, %v1538_v25  ;;  %v1883_v20 = vadd.f32 %v1848_v0, %v1847_v37  ;;  %v1849_v44 = vmul.f32 %v3485_v1, %v3485_v1  ;;  %v1573_v0 = vpop.f32.mrf.mxu1 }
 0x212   : > { %v1758_v6 = vpop.f32.mrf.mxu0 }
 0x213   : > { %v1850_v55 = vmul.f32 %v3489_v40, %v3489_v40  ;;  %v3497_v4 = vadd.f32 %v1758_v6, %v1542_v26  ;;  %1884 = vadd.xlane.f32.xlu0 %v1883_v20 }
 0x214   : > { %v1760_v9 = vpop.f32.mrf.mxu0 }
 0x215   : > { %v3501_v49 = vadd.f32 %v1760_v9, %v1544_v28  ;;  %v1886_v11 = vadd.f32 %v1850_v55, %v1849_v44  ;;  %v1851_v53 = vmul.f32 %v3497_v4, %v3497_v4  ;;  %v1575_v44 = vpop.f32.mrf.mxu1 }
 0x216   : > { %v1762_v23 = vpop.f32.mrf.mxu0 }
 0x217   : > { %v1852_v31 = vmul.f32 %v3501_v49, %v3501_v49  ;;  %v3509_v12 = vadd.f32 %v1762_v23, %v1546_v30  ;;  %1887 = vadd.xlane.f32.xlu1 %v1886_v11 }
 0x218   : > { %v1764_v29 = vpop.f32.mrf.mxu0 }
 0x219   : > { %v3513_v45 = vadd.f32 %v1764_v29, %v1548_v32  ;;  %v1889_v16 = vadd.f32 %v1852_v31, %v1851_v53  ;;  %v1853_v51 = vmul.f32 %v3509_v12, %v3509_v12  ;;  %v1577_v32 = vpop.f32.mrf.mxu1  ;;  %v1566_v31 = vadd.f32 %v1565_v22, %v3397_v47 }
 0x21a   : > { %v1768_v17 = vpop.f32.mrf.mxu0 }
 0x21b   : > { %v1854_v25 = vmul.f32 %v3513_v45, %v3513_v45  ;;  %v3521_v37 = vadd.f32 %v1768_v17, %v1552_v33  ;;  %1890 = vadd.xlane.f32.xlu0 %v1889_v16  ;;  %v1568_v33 = vadd.f32 %v1567_v21, %v3401_v50  ;;  %v1581_v17 = vpop.f32.mrf.mxu1 }
 0x21c   : > { %v1770_v5 = vpop.f32.mrf.mxu0 }
 0x21d   : > { %v3525_v59 = vadd.f32 %v1770_v5, %v1554_v35  ;;  %v1892_v26 = vadd.f32 %v1854_v25, %v1853_v51  ;;  %v1855_v3 = vmul.f32 %v3521_v37, %v3521_v37  ;;  %v1572_v51 = vadd.f32 %v1571_v13, %v3403_v52 }
 0x21e   : > { %v1772_v20 = vpop.f32.mrf.mxu0  ;;  %v1574_v5 = vadd.f32 %v1573_v0, %v3407_v54 }
 0x21f   : > { %v1856_v6 = vmul.f32 %v3525_v59, %v3525_v59  ;;  %v3533_v28 = vadd.f32 %v1772_v20, %v1556_v36  ;;  %1893 = vadd.xlane.f32.xlu1 %v1892_v26  ;;  %v1583_v26 = vpop.f32.mrf.mxu1 }
 0x220   : > { %v1774_v55 = vpop.f32.mrf.mxu0 }
 0x221   : > { %v3537_v10 = vadd.f32 %v1774_v55, %v1558_v38  ;;  %v1895_v9 = vadd.f32 %v1856_v6, %v1855_v3  ;;  %v1857_v62 = vmul.f32 %v3533_v28, %v3533_v28  ;;  %v1576_v38 = vadd.f32 %v1575_v44, %v3409_v43 }
 0x222   : > { %v1778_v30 = vpop.f32.mrf.mxu0  ;;  %v1578_v6 = vadd.f32 %v1577_v32, %v3413_v56 }
 0x223   : > { %v1858_v11 = vmul.f32 %v3537_v10, %v3537_v10  ;;  %v3544_v23 = vadd.f32 %v1778_v30, %v1562_v39  ;;  %1896 = vadd.xlane.f32.xlu0 %v1895_v9  ;;  %v1585_v39 = vpop.f32.mrf.mxu1  ;;  %v1582_v30 = vadd.f32 %v1581_v17, %v3415_v48 }
 0x224   : > { %v1780_v53 = vpop.f32.mrf.mxu0 }
 0x225   : > { %v3547_v42 = vadd.f32 %v1780_v53, %v1564_v41  ;;  %v1898_v60 = vadd.f32 %v1858_v11, %v1857_v62  ;;  %v1859_v46 = vmul.f32 %v3544_v23, %v3544_v23  ;;  %v1584_v62 = vadd.f32 %v1583_v26, %v3419_v57  ;;  %v1587_v53 = vpop.f32.mrf.mxu1 }
 0x226   : > { %v1782_v29 = vpop.f32.mrf.mxu0 }
 0x227   : > { %v1860_v8 = vmul.f32 %v3547_v42, %v3547_v42  ;;  %v3554_v16 = vadd.f32 %v1782_v29, %v1566_v31  ;;  %1899 = vadd.xlane.f32.xlu1 %v1898_v60  ;;  %v1586_v60 = vadd.f32 %v1585_v39, %v3421_v58 }
 0x228   : > { %v1784_v35 = vpop.f32.mrf.mxu0 }
 0x229   : > { %v3557_v47 = vadd.f32 %v1784_v35, %v1568_v33  ;;  %v1901_v22 = vadd.f32 %v1860_v8, %v1859_v46  ;;  %v1861_v50 = vmul.f32 %v3554_v16, %v3554_v16  ;;  %v1588_v46 = vadd.f32 %v1587_v53, %v3425_v61 }
 0x22a   : > { %v1788_v25 = vpop.f32.mrf.mxu0 }
 0x22b   : > { %v1862_v21 = vmul.f32 %v3557_v47, %v3557_v47  ;;  %v3564_v36 = vadd.f32 %v1788_v25, %v1572_v51  ;;  %1902 = vadd.xlane.f32.xlu0 %v1901_v22 }
 0x22c   : > { %v1790_v20 = vpop.f32.mrf.mxu0 }
 0x22d   : > { %v3567_v52 = vadd.f32 %v1790_v20, %v1574_v5  ;;  %v1904_v13 = vadd.f32 %v1862_v21, %v1861_v50  ;;  %v1863_v54 = vmul.f32 %v3564_v36, %v3564_v36 }
 0x22e   : > { %v1792_v3 = vpop.f32.mrf.mxu0 }
 0x22f   : > { %v1864_v0 = vmul.f32 %v3567_v52, %v3567_v52  ;;  %v3574_v55 = vadd.f32 %v1792_v3, %v1576_v38  ;;  %1905 = vadd.xlane.f32.xlu1 %v1904_v13 }
 0x230   : > { %v1794_v9 = vpop.f32.mrf.mxu0 }
 0x231   : > { %v3577_v43 = vadd.f32 %v1794_v9, %v1578_v6  ;;  %v1907_v44 = vadd.f32 %v1864_v0, %v1863_v54  ;;  %v1865_v56 = vmul.f32 %v3574_v55, %v3574_v55 }
 0x232   : > { %v1798_v41 = vpop.f32.mrf.mxu0 }
 0x233   : > { %v1866_v11 = vmul.f32 %v3577_v43, %v3577_v43  ;;  %v3584_v32 = vadd.f32 %v1798_v41, %v1582_v30  ;;  %1908 = vadd.xlane.f32.xlu0 %v1907_v44 }
 0x234   : > { %v1800_v31 = vpop.f32.mrf.mxu0 }
 0x235   : > { %v3587_v48 = vadd.f32 %v1800_v31, %v1584_v62  ;;  %v1910_v29 = vadd.f32 %v1866_v11, %v1865_v56  ;;  %v1867_v57 = vmul.f32 %v3584_v32, %v3584_v32 }
 0x236   : > { %v1802_v33 = vpop.f32.mrf.mxu0 }
 0x237   : > { %v1868_v8 = vmul.f32 %v3587_v48, %v3587_v48  ;;  %v3594_v17 = vadd.f32 %v1802_v33, %v1586_v60  ;;  %1911 = vadd.xlane.f32.xlu1 %v1910_v29 }
 0x238   : > { %v1804_v35 = vpop.f32.mrf.mxu0 }
 0x239   : > { %v3596_v51 = vadd.f32 %v1804_v35, %v1588_v46  ;;  %v1913_v22 = vadd.f32 %v1868_v8, %v1867_v57  ;;  %v1869_v58 = vmul.f32 %v3594_v17, %v3594_v17 }
 0x23b   : > { %v1870_v25 = vmul.f32 %v3596_v51, %v3596_v51  ;;  %1914 = vadd.xlane.f32.xlu0 %v1913_v22 }
 0x23d   : > { %v1916_v61 = vadd.f32 %v1870_v25, %v1869_v58 }
 0x23f   : > { %1917 = vadd.xlane.f32.xlu1 %v1916_v61 }
 0x28c   : > { %v1873_v5 = vpop.xlane.xlu0 %1872 }
 0x28d   : > { %2842 = vrsqrt.f32 %v1873_v5  ;;  %vm1921_vm0 = vcmp.eq.f32.partialorder %v1873_v5, inf  ;;  %v1924_v13 = vand.u32 2147483648, %v1873_v5  ;;  %vm1923_vm1 = vcmp.eq.f32.partialorder %v1873_v5, 0.0 }
 0x290   : > { %v1876_v50 = vpop.xlane.xlu0 %1875 }
 0x291   : > { %2844 = vrsqrt.f32 %v1876_v50  ;;  %vm1928_vm2 = vcmp.eq.f32.partialorder %v1876_v50, inf  ;;  %v1931_v30 = vand.u32 2147483648, %v1876_v50  ;;  %vm1930_vm3 = vcmp.eq.f32.partialorder %v1876_v50, 0.0 }
 0x294   : > { %v1879_v21 = vpop.xlane.xlu1 %1878 }
 0x295   : > { %2846 = vrsqrt.f32 %v1879_v21  ;;  %vm1935_vm4 = vcmp.eq.f32.partialorder %v1879_v21, inf  ;;  %v1938_v31 = vand.u32 2147483648, %v1879_v21  ;;  %vm1937_vm5 = vcmp.eq.f32.partialorder %v1879_v21, 0.0 }
 0x298   : > { %v1882_v26 = vpop.xlane.xlu1 %1881 }
 0x299   : > { %2848 = vrsqrt.f32 %v1882_v26  ;;  %vm1942_vm6 = vcmp.eq.f32.partialorder %v1882_v26, inf  ;;  %v1945_v35 = vand.u32 2147483648, %v1882_v26  ;;  %vm1944_vm7 = vcmp.eq.f32.partialorder %v1882_v26, 0.0 }
 0x29a   : > { %v2843_v20 = vpop.eup %2842 }
 0x29b   : > { %v1920_v38 = vmul.f32 %v2843_v20, %v1873_v5 }
 0x29c   : > { %v1885_v3 = vpop.xlane.xlu0 %1884 }
 0x29d   : > { %v1922_v6 = vsel %vm1921_vm0, %v1873_v5, %v1920_v38  ;;  %2850 = vrsqrt.f32 %v1885_v3  ;;  %vm1949_vm8 = vcmp.eq.f32.partialorder %v1885_v3, inf  ;;  %vm1951_vm9 = vcmp.eq.f32.partialorder %v1885_v3, 0.0 }
 0x29e   : > { %v2845_v54 = vpop.eup %2844  ;;  %v1925_v0 = vsel %vm1923_vm1, %v1924_v13, %v1922_v6 }
 0x29f   : > { %v2031_v39 = vadd.f32 1e-05, %v1925_v0  ;;  %v1927_v9 = vmul.f32 %v2845_v54, %v1876_v50 }
 0x2a0   : > { %v1888_v44 = vpop.xlane.xlu1 %1887 }
 0x2a1   : > { %2852 = vrcp.f32 %v2031_v39  ;;  %v1929_v41 = vsel %vm1928_vm2, %v1876_v50, %v1927_v9  ;;  %vm1956_vm10 = vcmp.eq.f32.partialorder %v1888_v44, inf  ;;  %vm1958_vm11 = vcmp.eq.f32.partialorder %v1888_v44, 0.0 }
 0x2a2   : > { %v2847_v62 = vpop.eup %2846  ;;  %v1932_v56 = vsel %vm1930_vm3, %v1931_v30, %v1929_v41  ;;  %2854 = vrsqrt.f32 %v1888_v44  ;;  %v1959_v41 = vand.u32 2147483648, %v1888_v44 }
 0x2a3   : > { %v2032_v11 = vadd.f32 1e-05, %v1932_v56  ;;  %v1934_v53 = vmul.f32 %v2847_v62, %v1879_v21 }
 0x2a4   : > { %v3602_v60 = vpop.xlane.xlu0 %1890 }
 0x2a5   : > { %2856 = vrcp.f32 %v2032_v11  ;;  %v1936_v29 = vsel %vm1935_vm4, %v1879_v21, %v1934_v53  ;;  %v1952_v21 = vand.u32 2147483648, %v1885_v3  ;;  %vm1963_vm12 = vcmp.eq.f32.partialorder %v3602_v60, inf }
 0x2a6   : > { %v2849_v33 = vpop.eup %2848  ;;  %v1939_v46 = vsel %vm1937_vm5, %v1938_v31, %v1936_v29  ;;  %2858 = vrsqrt.f32 %v3602_v60  ;;  %vm1965_vm13 = vcmp.eq.f32.partialorder %v3602_v60, 0.0 }
 0x2a7   : > { %v2033_v57 = vadd.f32 1e-05, %v1939_v46  ;;  %v1941_v8 = vmul.f32 %v2849_v33, %v1882_v26 }
 0x2a8   : > { %v3605_v22 = vpop.xlane.xlu1 %1893 }
 0x2a9   : > { %2860 = vrcp.f32 %v2033_v57  ;;  %v1943_v58 = vsel %vm1942_vm6, %v1882_v26, %v1941_v8  ;;  %vm1970_vm14 = vcmp.eq.f32.partialorder %v3605_v22, inf  ;;  %vm1972_vm15 = vcmp.eq.f32.partialorder %v3605_v22, 0.0 }
 0x2aa   : > { %v2851_v25 = vpop.eup %2850  ;;  %v1946_v61 = vsel %vm1944_vm7, %v1945_v35, %v1943_v58  ;;  %2862 = vrsqrt.f32 %v3605_v22 }
 0x2ab   : > { %v2034_v5 = vadd.f32 1e-05, %v1946_v61  ;;  %v1948_v50 = vmul.f32 %v2851_v25, %v1885_v3 }
 0x2ac   : > { %v3608_v20 = vpop.xlane.xlu0 %1896 }
 0x2ad   : > { %2864 = vrcp.f32 %v2034_v5  ;;  %v1950_v38 = vsel %vm1949_vm8, %v1885_v3, %v1948_v50  ;;  %vm1977_vm0 = vcmp.eq.f32.partialorder %v3608_v20, inf  ;;  %vm1979_vm1 = vcmp.eq.f32.partialorder %v3608_v20, 0.0 }
 0x2ae   : > { %v2853_v13 = vpop.eup %2852  ;;  %v1953_v6 = vsel %vm1951_vm9, %v1952_v21, %v1950_v38  ;;  %2866 = vrsqrt.f32 %v3608_v20  ;;  %v1973_v21 = vand.u32 2147483648, %v3605_v22 }
 0x2af   : > { %v2855_v54 = vpop.eup %2854  ;;  %v2063_v26 = vmul.f32 %v2853_v13, %v3427_v2  ;;  %v2064_v0 = vmul.f32 %v2853_v13, %v3431_v7  ;;  %v2035_v39 = vadd.f32 1e-05, %v1953_v6 }
 0x2b0   : > { %v1955_v9 = vmul.f32 %v2855_v54, %v1888_v44  ;;  %v3619_v30 = vpop.xlane.xlu1 %1899 }
 0x2b1   : > { %v2497_v3 = vpack.c.bf16 %v2064_v0, %v2063_v26  ;;  %2868 = vrcp.f32 %v2035_v39  ;;  %vm1984_vm2 = vcmp.eq.f32.partialorder %v3619_v30, inf  ;;  %vm1986_vm3 = vcmp.eq.f32.partialorder %v3619_v30, 0.0 }
 0x2b2   : > { %v2857_v62 = vpop.eup %2856  ;;  %v1957_v56 = vsel %vm1956_vm10, %v1888_v44, %v1955_v9  ;;  %2870 = vrsqrt.f32 %v3619_v30  ;;  %v1966_v44 = vand.u32 2147483648, %v3602_v60  ;;  %v1980_v9 = vand.u32 2147483648, %v3608_v20 }
 0x2b3   : > { %v2859_v2 = vpop.eup %2858  ;;  %2191 = vst [vmem:[%s3617_s16] sm:$0xff] %v2497_v3  ;;  %v2065_v7 = vmul.f32 %v2857_v62, %v3433_v63  ;;  %v2066_v11 = vmul.f32 %v2857_v62, %v3441_v14  ;;  %v1960_v53 = vsel %vm1958_vm11, %v1959_v41, %v1957_v56 }
 0x2b4   : > { %v2036_v31 = vadd.f32 1e-05, %v1960_v53  ;;  %v1962_v29 = vmul.f32 %v2859_v2, %v3602_v60  ;;  %v3626_v33 = vpop.xlane.xlu0 %1902  ;;  %v1987_v53 = vand.u32 2147483648, %v3619_v30 }
 0x2b5   : > { %v2498_v46 = vpack.c.bf16 %v2066_v11, %v2065_v7  ;;  %2872 = vrsqrt.f32 %v3626_v33  ;;  %vm1991_vm4 = vcmp.eq.f32.partialorder %v3626_v33, inf  ;;  %vm1993_vm5 = vcmp.eq.f32.partialorder %v3626_v33, 0.0 }
 0x2b6   : > { %v2861_v57 = vpop.eup %2860  ;;  %2874 = vrcp.f32 %v2036_v31  ;;  %v1964_v8 = vsel %vm1963_vm12, %v3602_v60, %v1962_v29 }
 0x2b7   : > { %v2863_v63 = vpop.eup %2862  ;;  %2192 = vst [vmem:[%s3617_s16 + $0x8] sm:$0xff] %v2498_v46  ;;  %v2067_v14 = vmul.f32 %v2861_v57, %v3447_v19  ;;  %v2068_v35 = vmul.f32 %v2861_v57, %v3452_v18  ;;  %v1967_v58 = vsel %vm1965_vm13, %v1966_v44, %v1964_v8  ;;  %v1994_v8 = vand.u32 2147483648, %v3626_v33 }
 0x2b8   : > { %v2037_v25 = vadd.f32 1e-05, %v1967_v58  ;;  %v1969_v61 = vmul.f32 %v2863_v63, %v3605_v22  ;;  %v3637_v5 = vpop.xlane.xlu1 %1905 }
 0x2b9   : > { %v2499_v50 = vpack.c.bf16 %v2068_v35, %v2067_v14  ;;  %2876 = vrsqrt.f32 %v3637_v5  ;;  %vm1998_vm6 = vcmp.eq.f32.partialorder %v3637_v5, inf  ;;  %vm2000_vm7 = vcmp.eq.f32.partialorder %v3637_v5, 0.0 }
 0x2ba   : > { %v2865_v60 = vpop.eup %2864  ;;  %2878 = vrcp.f32 %v2037_v25  ;;  %v1971_v38 = vsel %vm1970_vm14, %v3605_v22, %v1969_v61 }
 0x2bb   : > { %v2867_v19 = vpop.eup %2866  ;;  %2193 = vst [vmem:[%s3617_s16 + $0x10] sm:$0xff] %v2499_v50  ;;  %v2069_v18 = vmul.f32 %v2865_v60, %v3455_v24  ;;  %v2070_v13 = vmul.f32 %v2865_v60, %v3465_v27  ;;  %v1974_v6 = vsel %vm1972_vm15, %v1973_v21, %v1971_v38 }
 0x2bc   : > { %v2038_v54 = vadd.f32 1e-05, %v1974_v6  ;;  %v1976_v26 = vmul.f32 %v2867_v19, %v3608_v20  ;;  %v3648_v0 = vpop.xlane.xlu0 %1908 }
 0x2bd   : > { %v2500_v39 = vpack.c.bf16 %v2070_v13, %v2069_v18  ;;  %2880 = vrsqrt.f32 %v3648_v0  ;;  %vm2005_vm8 = vcmp.eq.f32.partialorder %v3648_v0, inf  ;;  %vm2007_vm9 = vcmp.eq.f32.partialorder %v3648_v0, 0.0 }
 0x2be   : > { %v2869_v22 = vpop.eup %2868  ;;  %2882 = vrcp.f32 %v2038_v54  ;;  %v1978_v3 = vsel %vm1977_vm0, %v3608_v20, %v1976_v26  ;;  %v2008_v26 = vand.u32 2147483648, %v3648_v0 }
 0x2bf   : > { %v2871_v24 = vpop.eup %2870  ;;  %2194 = vst [vmem:[%s3617_s16 + $0x18] sm:$0xff] %v2500_v39  ;;  %v2071_v27 = vmul.f32 %v2869_v22, %v3473_v15  ;;  %v2072_v41 = vmul.f32 %v2869_v22, %v3477_v34  ;;  %v1981_v62 = vsel %vm1979_vm1, %v1980_v9, %v1978_v3 }
 0x2c0   : > { %v2039_v56 = vadd.f32 1e-05, %v1981_v62  ;;  %v1983_v2 = vmul.f32 %v2871_v24, %v3619_v30  ;;  %v3659_v7 = vpop.xlane.xlu1 %1911 }
 0x2c1   : > { %v2501_v11 = vpack.c.bf16 %v2072_v41, %v2071_v27  ;;  %2884 = vrsqrt.f32 %v3659_v7  ;;  %vm2012_vm10 = vcmp.eq.f32.partialorder %v3659_v7, inf  ;;  %v2015_v41 = vand.u32 2147483648, %v3659_v7 }
 0x2c2   : > { %v2873_v20 = vpop.eup %2872  ;;  %2886 = vrcp.f32 %v2039_v56  ;;  %v1985_v31 = vsel %vm1984_vm2, %v3619_v30, %v1983_v2  ;;  %vm2014_vm11 = vcmp.eq.f32.partialorder %v3659_v7, 0.0 }
 0x2c3   : > { %v2875_v15 = vpop.eup %2874  ;;  %2195 = vst [vmem:[%s3617_s16 + $0x20] sm:$0xff] %v2501_v11  ;;  %v1988_v34 = vsel %vm1986_vm3, %v1987_v53, %v1985_v31  ;;  %v1990_v29 = vmul.f32 %v2873_v20, %v3626_v33 }
 0x2c4   : > { %v2073_v46 = vmul.f32 %v2875_v15, %v3485_v1  ;;  %v2074_v44 = vmul.f32 %v2875_v15, %v3489_v40  ;;  %v2040_v57 = vadd.f32 1e-05, %v1988_v34  ;;  %v3672_v63 = vpop.xlane.xlu0 %1914 }
 0x2c5   : > { %v1992_v14 = vsel %vm1991_vm4, %v3626_v33, %v1990_v29  ;;  %2888 = vrsqrt.f32 %v3672_v63  ;;  %v2001_v33 = vand.u32 2147483648, %v3637_v5  ;;  %vm2019_vm12 = vcmp.eq.f32.partialorder %v3672_v63, inf }
 0x2c6   : > { %v2877_v30 = vpop.eup %2876  ;;  %v2502_v35 = vpack.c.bf16 %v2074_v44, %v2073_v46  ;;  %2890 = vrcp.f32 %v2040_v57  ;;  %v1995_v58 = vsel %vm1993_vm5, %v1994_v8, %v1992_v14  ;;  %v2022_v31 = vand.u32 2147483648, %v3672_v63 }
 0x2c7   : > { %v2879_v25 = vpop.eup %2878  ;;  %v2041_v61 = vadd.f32 1e-05, %v1995_v58  ;;  %v1997_v1 = vmul.f32 %v2877_v30, %v3637_v5  ;;  %vm2021_vm13 = vcmp.eq.f32.partialorder %v3672_v63, 0.0 }
 0x2c8   : > { %2196 = vst [vmem:[%s3617_s16 + $0x28] sm:$0xff] %v2502_v35  ;;  %v2075_v40 = vmul.f32 %v2879_v25, %v3497_v4  ;;  %v2076_v50 = vmul.f32 %v2879_v25, %v3501_v49  ;;  %v3683_v21 = vpop.xlane.xlu1 %1917 }
 0x2c9   : > { %2892 = vrcp.f32 %v2041_v61  ;;  %v1999_v60 = vsel %vm1998_vm6, %v3637_v5, %v1997_v1  ;;  %vm2026_vm14 = vcmp.eq.f32.partialorder %v3683_v21, inf  ;;  %vm2028_vm15 = vcmp.eq.f32.partialorder %v3683_v21, 0.0 }
 0x2ca   : > { %v2881_v38 = vpop.eup %2880  ;;  %v2503_v19 = vpack.c.bf16 %v2076_v50, %v2075_v40  ;;  %v2002_v18 = vsel %vm2000_vm7, %v2001_v33, %v1999_v60  ;;  %2894 = vrsqrt.f32 %v3683_v21 }
 0x2cb   : > { %v2883_v13 = vpop.eup %2882  ;;  %v2042_v4 = vadd.f32 1e-05, %v2002_v18  ;;  %v2004_v49 = vmul.f32 %v2881_v38, %v3648_v0 }
 0x2cc   : > { %2197 = vst [vmem:[%s3617_s16 + $0x30] sm:$0xff] %v2503_v19  ;;  %v2077_v6 = vmul.f32 %v2883_v13, %v3509_v12  ;;  %v2078_v54 = vmul.f32 %v2883_v13, %v3513_v45 }
 0x2cd   : > { %2896 = vrcp.f32 %v2042_v4  ;;  %v2006_v5 = vsel %vm2005_vm8, %v3648_v0, %v2004_v49 }
 0x2ce   : > { %v2885_v39 = vpop.eup %2884  ;;  %v2504_v9 = vpack.c.bf16 %v2078_v54, %v2077_v6  ;;  %v2009_v22 = vsel %vm2007_vm9, %v2008_v26, %v2006_v5 }
 0x2cf   : > { %v2887_v3 = vpop.eup %2886  ;;  %v2043_v24 = vadd.f32 1e-05, %v2009_v22  ;;  %v2011_v27 = vmul.f32 %v2885_v39, %v3659_v7 }
 0x2d0   : > { %2198 = vst [vmem:[%s3617_s16 + $0x38] sm:$0xff] %v2504_v9  ;;  %v2079_v12 = vmul.f32 %v2887_v3, %v3521_v37  ;;  %v2080_v45 = vmul.f32 %v2887_v3, %v3525_v59 }
 0x2d1   : > { %2898 = vrcp.f32 %v2043_v24  ;;  %v2013_v0 = vsel %vm2012_vm10, %v3659_v7, %v2011_v27 }
 0x2d2   : > { %v2889_v62 = vpop.eup %2888  ;;  %v2505_v56 = vpack.c.bf16 %v2080_v45, %v2079_v12  ;;  %v2016_v2 = vsel %vm2014_vm11, %v2015_v41, %v2013_v0 }
 0x2d3   : > { %v2891_v11 = vpop.eup %2890  ;;  %v2044_v53 = vadd.f32 1e-05, %v2016_v2  ;;  %v2018_v20 = vmul.f32 %v2889_v62, %v3672_v63 }
 0x2d4   : > { %2199 = vst [vmem:[%s3617_s16 + $0x40] sm:$0xff] %v2505_v56  ;;  %v2081_v37 = vmul.f32 %v2891_v11, %v3533_v28  ;;  %v2082_v59 = vmul.f32 %v2891_v11, %v3537_v10 }
 0x2d5   : > { %2900 = vrcp.f32 %v2044_v53  ;;  %v2020_v7 = vsel %vm2019_vm12, %v3672_v63, %v2018_v20  ;;  %v2029_v63 = vand.u32 2147483648, %v3683_v21 }
 0x2d6   : > { %v2893_v15 = vpop.eup %2892  ;;  %v2506_v34 = vpack.c.bf16 %v2082_v59, %v2081_v37  ;;  %v2023_v29 = vsel %vm2021_vm13, %v2022_v31, %v2020_v7 }
 0x2d7   : > { %v2895_v46 = vpop.eup %2894  ;;  %v2083_v44 = vmul.f32 %v2893_v15, %v3544_v23  ;;  %v2084_v28 = vmul.f32 %v2893_v15, %v3547_v42  ;;  %v2045_v57 = vadd.f32 1e-05, %v2023_v29 }
 0x2d8   : > { %2200 = vst [vmem:[%s3617_s16 + $0x48] sm:$0xff] %v2506_v34  ;;  %v2025_v10 = vmul.f32 %v2895_v46, %v3683_v21 }
 0x2d9   : > { %v2507_v8 = vpack.c.bf16 %v2084_v28, %v2083_v44  ;;  %2902 = vrcp.f32 %v2045_v57 }
 0x2da   : > { %v2897_v14 = vpop.eup %2896  ;;  %v2027_v30 = vsel %vm2026_vm14, %v3683_v21, %v2025_v10 }
 0x2db   : > { %2201 = vst [vmem:[%s3617_s16 + $0x50] sm:$0xff] %v2507_v8  ;;  %v2085_v23 = vmul.f32 %v2897_v14, %v3554_v16  ;;  %v2086_v42 = vmul.f32 %v2897_v14, %v3557_v47  ;;  %v2030_v35 = vsel %vm2028_vm15, %v2029_v63, %v2027_v30 }
 0x2dc   : > { %v2046_v58 = vadd.f32 1e-05, %v2030_v35 }
 0x2dd   : > { %v2508_v25 = vpack.c.bf16 %v2086_v42, %v2085_v23 }
 0x2de   : > { %v2899_v61 = vpop.eup %2898  ;;  %2904 = vrcp.f32 %v2046_v58 }
 0x2df   : > { %2202 = vst [vmem:[%s3617_s16 + $0x58] sm:$0xff] %v2508_v25  ;;  %v2087_v1 = vmul.f32 %v2899_v61, %v3564_v36  ;;  %v2088_v40 = vmul.f32 %v2899_v61, %v3567_v52 }
 0x2e1   : > { %v2509_v50 = vpack.c.bf16 %v2088_v40, %v2087_v1 }
 0x2e2   : > { %v2901_v33 = vpop.eup %2900 }
 0x2e3   : > { %2203 = vst [vmem:[%s3617_s16 + $0x60] sm:$0xff] %v2509_v50  ;;  %v2089_v16 = vmul.f32 %v2901_v33, %v3574_v55  ;;  %v2090_v47 = vmul.f32 %v2901_v33, %v3577_v43 }
 0x2e5   : > { %v2510_v21 = vpack.c.bf16 %v2090_v47, %v2089_v16 }
 0x2e6   : > { %v2903_v60 = vpop.eup %2902 }
 0x2e7   : > { %2204 = vst [vmem:[%s3617_s16 + $0x68] sm:$0xff] %v2510_v21  ;;  %v2091_v38 = vmul.f32 %v2903_v60, %v3584_v32  ;;  %v2092_v19 = vmul.f32 %v2903_v60, %v3587_v48 }
 0x2e9   : > { %v2511_v18 = vpack.c.bf16 %v2092_v19, %v2091_v38 }
 0x2eb   : > { %v2905_v13 = vpop.eup %2904  ;;  %2205 = vst [vmem:[%s3617_s16 + $0x70] sm:$0xff] %v2511_v18 }
 0x2ec   : > { %v2093_v36 = vmul.f32 %v2905_v13, %v3594_v17  ;;  %v2094_v52 = vmul.f32 %v2905_v13, %v3596_v51 }
 0x2ee   : > { %v2512_v4 = vpack.c.bf16 %v2094_v52, %v2093_v36 }
 0x2f0   : > { %2206 = vst [vmem:[%s3617_s16 + $0x78] sm:$0xff] %v2512_v4 }
 0x2f1 PF: > { %s18_s29 = sadd.s32 1, %s2928_s29   ;;  %s3754_s27 = smov %s2924_s28 }
 0x2f2   : > { %p15_p5 = scmp.ge.s32.totalorder %s18_s29, 4   ;;  %s3755_s28 = smov %s3757_s30 }
 0x2f4   :  { %17 = sbr.rel (!%p15_p5) target bundleno = 2 (0x2), region = 88 }

</bundles_post_ra>
